<compile_context>
chip_gen: v6e
topology: v6e:2x2x1
jax: 0.10.0
libtpu: 0.0.40
codegen_flags: <defaults>
</compile_context>

<pallas_src>
import functools

import jax
import jax.numpy as jnp
from jax import lax
from jax.experimental import pallas as pl
from jax.experimental.pallas import tpu as pltpu

MN_LIM = -100.0     # self.mn_lim in the reference
NEG_INF = -1.0e30   # removes already-picked top-k entries / init of the running max


def _online_recale_topk(cur, sim_p, *, k, margin, inv_tau, axis):
    """k hardest negatives along `axis` with hinge + tau-softmax, as an online softmax.

    Values-only variant: every lane tied with the current max is masked in one step
    (diverges from torch.topk only under exact float ties).  Returns the reduced loss
    (shape of sim_p): sum_k loss_k * softmax_k(z) with z = where(loss==0, mn_lim, sim_n)/tau.
    """
    red_shape = list(cur.shape)
    red_shape[axis] = 1
    init = (cur,
            jnp.full(red_shape, NEG_INF, jnp.float32),   # running max of z
            jnp.zeros(red_shape, jnp.float32),           # running sum exp(z - m)
            jnp.zeros(red_shape, jnp.float32))           # running sum loss * exp(z - m)

    def body(_, carry):
        cur, m_run, s_run, w_run = carry
        v = jnp.max(cur, axis=axis, keepdims=True)                   # hard negative value
        lss = jnp.maximum(0.0, v - sim_p + margin)
        z = jnp.where(lss == 0.0, MN_LIM, v) * inv_tau
        m_new = jnp.maximum(m_run, z)
        a = jnp.exp(m_run - m_new)
        e = jnp.exp(z - m_new)
        cur = jnp.where(cur == v, NEG_INF, cur)                      # mask all ties
        return cur, m_new, a * s_run + e, a * w_run + lss * e

    if k <= 8:                       # small k: unroll (LLO scheduler visibility)
        carry = init
        for _ in range(k):
            carry = body(0, carry)
    else:                            # reference default k=100: rolled loop, small carry
        carry = lax.fori_loop(0, k, body, init)
    _, _, s_run, w_run = carry
    return w_run * pl.reciprocal(s_run, approx=True)


def fused_kernel(out_ref, outi_ref, tgt_ref, pb_ref, pi_ref, pr_ref,
                 base_ref, inter_ref, rps_ref, rpc_ref, rns_ref, rnc_ref,
                 *, k, margin, inv_tau, margin_reg, n_valid, tile_r, n_arb):
    """Base triplet (output), inter triplet (output_i) and RegLoss partials, one row tile."""
    c = pl.program_id(0)             # "parallel" axis (megacore split on v7x)
    i = pl.program_id(1)             # "arbitrary" reduction axis over row tiles

    @pl.when(i == 0)
    def _init():
        for r in (base_ref, inter_ref, rps_ref, rpc_ref, rns_ref, rnc_ref):
            r[...] = jnp.zeros_like(r)

    out = out_ref[...].astype(jnp.float32)      # (R, L) — inputs may be f32 or bf16
    outi = outi_ref[...].astype(jnp.float32)
    neg = tgt_ref[...] == 0                     # target may be f32 / bf16 / int8 / bool
    n_rows, n_cols = out.shape

    lane = lax.broadcasted_iota(jnp.int32, (n_rows, n_cols), 1)
    sub = lax.broadcasted_iota(jnp.int32, (n_rows, 1), 0)
    tile_idx = c * n_arb + i                    # logical row-tile index
    valid = (tile_idx * tile_r + sub) < n_valid                      # (R, 1) real rows

    # Sampled-positive gathers (base / inter / reg use independent samples).
    sim_p_b = jnp.sum(jnp.where(lane == pb_ref[...], out, 0.0), axis=1, keepdims=True)
    sim_p_i = jnp.sum(jnp.where(lane == pi_ref[...], outi, 0.0), axis=1, keepdims=True)
    pos_r = lane == pr_ref[...]
    sim_p_rf = jnp.sum(jnp.where(pos_r, out, 0.0), axis=1, keepdims=True)
    sim_p_ri = jnp.sum(jnp.where(pos_r, outi, 0.0), axis=1, keepdims=True)

    # RegLoss positive part (no divide-by-zero guard later, matching the reference).
    loss_p = jnp.maximum(0.0, sim_p_ri - sim_p_rf + margin_reg)
    loss_p = jnp.where(valid, loss_p, 0.0)
    rps_ref[...] += jnp.sum(loss_p, axis=0, keepdims=True)
    rpc_ref[...] += jnp.sum((loss_p > 0.0).astype(jnp.float32), axis=0, keepdims=True)

    # ---- shared top-k over `output`: base triplet (online recale softmax) + RegLoss
    # negatives.  output_i must be gathered at the SAME hard-negative index, so the
    # exact first-occurrence index is kept in this loop only.
    def body(_, carry):
        cur, m_run, s_run, w_run, rn_sum, rn_cnt = carry
        v = jnp.max(cur, axis=1, keepdims=True)                      # (R, 1) hard negative
        idx = jnp.min(jnp.where(cur == v, lane, n_cols), axis=1, keepdims=True)
        sel = lane == idx                                            # first occurrence only
        # base triplet: online-softmax step
        lss = jnp.maximum(0.0, v - sim_p_b + margin)
        z = jnp.where(lss == 0.0, MN_LIM, v) * inv_tau
        m_new = jnp.maximum(m_run, z)
        a = jnp.exp(m_run - m_new)
        e = jnp.exp(z - m_new)
        # RegLoss negative part at the same index
        sim_n_i = jnp.sum(jnp.where(sel, outi, 0.0), axis=1, keepdims=True)
        ln = jnp.maximum(0.0, v - sim_n_i + margin_reg)
        ln = jnp.where(valid, ln, 0.0)
        return (jnp.where(sel, NEG_INF, cur), m_new,
                a * s_run + e, a * w_run + lss * e,
                rn_sum + jnp.sum(ln, axis=0, keepdims=True),
                rn_cnt + jnp.sum((ln > 0.0).astype(jnp.float32), axis=0, keepdims=True))

    init = (jnp.where(neg, out, MN_LIM),
            jnp.full((n_rows, 1), NEG_INF, jnp.float32),
            jnp.zeros((n_rows, 1), jnp.float32),
            jnp.zeros((n_rows, 1), jnp.float32),
            jnp.zeros((1, 1), jnp.float32),
            jnp.zeros((1, 1), jnp.float32))
    if k <= 8:
        carry = init
        for _ in range(k):
            carry = body(0, carry)
    else:
        carry = lax.fori_loop(0, k, body, init)
    _, _, s_run, w_run, rn_sum, rn_cnt = carry
    per_row = jnp.where(valid, w_run * pl.reciprocal(s_run, approx=True), 0.0)
    base_ref[...] += jnp.sum(per_row, axis=0, keepdims=True)
    rns_ref[...] += rn_sum
    rnc_ref[...] += rn_cnt

    # ---- inter term over `output_i`: values only (no index gather needed).
    per_row_i = _online_recale_topk(jnp.where(neg, outi, MN_LIM), sim_p_i,
                                    k=k, margin=margin, inv_tau=inv_tau, axis=1)
    inter_ref[...] += jnp.sum(jnp.where(valid, per_row_i, 0.0), axis=0, keepdims=True)


def dual_kernel(outi_ref, tgt_ref, pd_ref, dual_ref,
                *, k, margin, inv_tau, n_valid, tile_c, n_arb):
    """criterion(output_i.T, target.T) on column tiles of the UNtransposed arrays."""
    c = pl.program_id(0)
    j = pl.program_id(1)

    @pl.when(j == 0)
    def _init():
        dual_ref[...] = jnp.zeros_like(dual_ref)

    outi = outi_ref[...].astype(jnp.float32)    # (B, TILE_C)
    neg = tgt_ref[...] == 0
    n_rows, n_cols = outi.shape

    sub = lax.broadcasted_iota(jnp.int32, (n_rows, n_cols), 0)
    lane = lax.broadcasted_iota(jnp.int32, (1, n_cols), 1)
    tile_idx = c * n_arb + j
    valid = (tile_idx * tile_c + lane) < n_valid                      # (1, TILE_C) real labels

    sim_p = jnp.sum(jnp.where(sub == pd_ref[...], outi, 0.0), axis=0, keepdims=True)
    per_lbl = _online_recale_topk(jnp.where(neg, outi, MN_LIM), sim_p,
                                  k=k, margin=margin, inv_tau=inv_tau, axis=0)
    dual_ref[...] += jnp.sum(jnp.where(valid, per_lbl, 0.0), axis=1, keepdims=True)


# ------------------------------- wrapper / glue --------------------------------------

def _vmem_limit_bytes():
    """Per-generation VMEM budget: ~96 MiB on v5e/v6e (128 MiB phys), ~48 MiB on v7x (64 MiB)."""
    try:
        phys = int(getattr(pltpu.get_tpu_info(), "vmem_capacity_bytes", 0)) or 64 * 1024 * 1024
    except Exception:
        phys = 64 * 1024 * 1024
    return min(phys * 3 // 4, 100 * 1024 * 1024)


def _pick_row_tile(B, L, stream_bytes, budget):
    # per-row cost: double-buffered streamed inputs + ~5 f32 in-kernel working copies.
    per_row = L * (2 * stream_bytes + 20)
    t = min(1024, max(32, (budget // max(per_row, 1)) // 32 * 32))
    return B if B <= t else t    # full dim is always layout-legal; else multiple of 32


def _pick_col_tile(B, L, stream_bytes, budget):
    per_col = B * (2 * stream_bytes + 16)
    t = min(2048, max(128, (budget // max(per_col, 1)) // 128 * 128))
    return L if L <= t else t
    # TODO(synk): for very large B (or L), stream the full axis in chunks with a
    # (tile, k) running top-k scratch instead of loading the whole axis per block.


def sample_positive(key, target, axis):
    """torch.multinomial(target, 1): one uniformly-sampled positive index per slice."""
    logits = jnp.where(target > 0, 0.0, -jnp.inf)
    return jax.random.categorical(key, logits, axis=axis).astype(jnp.int32)


def triplet_loss_w_reg(key, output, target, output_i, *,
                       margin=0.3, margin_min=0.0, margin_reg=0.1,
                       num_negatives=4, tau=0.1, reg=0.1, dual=1.0, inter=1.0,
                       num_cores=2, compact_dtypes=False):
    """JAX/Pallas equivalent of TripletLossWReg.forward (static-margin path)."""
    if margin_min > 0.0:
        # TODO(synk): dynamic-margin path (margin_min > 0) not implemented.
        raise NotImplementedError("dynamic margin (margin_min > 0) is not supported")
    B, L = output.shape
    k1, k2, k3, k4 = jax.random.split(key, 4)
    pb = sample_positive(k1, target, -1).reshape(B, 1)   # base triplet positives
    pi = sample_positive(k2, target, -1).reshape(B, 1)   # inter triplet positives
    pr = sample_positive(k4, target, -1).reshape(B, 1)   # reg-loss positives
    pd = sample_positive(k3, target, 0).reshape(1, L)    # dual positives (no target.T copy)

    if compact_dtypes:
        # Only worth it when the producers already emit compact dtypes or when
        # output_i / target are reused (dual > 0); the kernel upcasts in-VMEM.
        output = output.astype(jnp.bfloat16)
        output_i = output_i.astype(jnp.bfloat16)
        target = target.astype(jnp.int8)

    vmem_limit = _vmem_limit_bytes()
    budget = (vmem_limit * 3) // 5
    params = pltpu.CompilerParams(dimension_semantics=("parallel", "arbitrary"),
                                  vmem_limit_bytes=vmem_limit)
    inv_tau = float(1.0 / tau)
    f32 = jnp.float32

    # ---------------- fused row-tile pass: base triplet + inter triplet + RegLoss ----
    stream_b = output.dtype.itemsize + output_i.dtype.itemsize + target.dtype.itemsize
    tile_r = _pick_row_tile(B, L, stream_b, budget)
    n_tr = pl.cdiv(B, tile_r)
    n_par = max(1, min(num_cores, n_tr))
    n_arb = pl.cdiv(n_tr, n_par)
    # Out-of-range logical tiles (when n_par*n_arb > n_tr) clamp to the last block;
    # their rows fail the in-kernel validity mask and contribute exactly 0.
    row_idx = lambda c, i, na=n_arb, nt=n_tr: (jnp.minimum(c * na + i, nt - 1), 0)
    row_spec = pl.BlockSpec((tile_r, L), row_idx)        # full label axis per tile
    idx_spec = pl.BlockSpec((tile_r, 1), row_idx)
    acc_spec = pl.BlockSpec((1, 128), lambda c, i: (0, c))   # per-core resident accumulator
    acc_shape = jax.ShapeDtypeStruct((1, n_par * 128), f32)

    outs = pl.pallas_call(
        functools.partial(fused_kernel, k=num_negatives, margin=float(margin),
                          inv_tau=inv_tau, margin_reg=float(margin_reg),
                          n_valid=B, tile_r=tile_r, n_arb=n_arb),
        grid=(n_par, n_arb),
        in_specs=[row_spec, row_spec, row_spec, idx_spec, idx_spec, idx_spec],
        out_specs=(acc_spec,) * 6,
        out_shape=(acc_shape,) * 6,
        compiler_params=params,
    )(output, output_i, target, pb, pi, pr)
    # Each 128-lane slot holds one core's partial (replicated across lanes): pick lane 0.
    base_s, inter_s, rps, rpc, rns, rnc = [jnp.sum(o[0, ::128]) for o in outs]

    loss = base_s / B
    if inter > 0:
        loss = loss + inter * (inter_s / B)

    if dual > 0:
        # TODO(synk): the dual term could be fused into the row-tile pass with a (k, L)
        # running top-k scratch if the fused kernel turns out HBM-bound, not XLU-bound.
        stream_d = output_i.dtype.itemsize + target.dtype.itemsize
        tile_c = _pick_col_tile(B, L, stream_d, budget)
        n_tc = pl.cdiv(L, tile_c)
        n_par_d = max(1, min(num_cores, n_tc))
        n_arb_d = pl.cdiv(n_tc, n_par_d)
        col_idx = lambda c, j, na=n_arb_d, nt=n_tc: (0, jnp.minimum(c * na + j, nt - 1))
        col_spec = pl.BlockSpec((B, tile_c), col_idx)    # full batch axis per tile
        cidx_spec = pl.BlockSpec((1, tile_c), col_idx)
        dual_out = pl.pallas_call(
            functools.partial(dual_kernel, k=num_negatives, margin=float(margin),
                              inv_tau=inv_tau, n_valid=L, tile_c=tile_c, n_arb=n_arb_d),
            grid=(n_par_d, n_arb_d),
            in_specs=[col_spec, col_spec, cidx_spec],
            out_specs=pl.BlockSpec((1, 128), lambda c, j: (0, c)),
            out_shape=jax.ShapeDtypeStruct((1, n_par_d * 128), f32),
            compiler_params=params,
        )(output_i, target, pd)
        loss = loss + dual * (jnp.sum(dual_out[0, ::128]) / L)

    if reg > 0:
        # Matches the reference exactly: no divide-by-zero guard (reference has none).
        loss = loss + reg * 0.5 * (rps / rpc + rns / rnc)
    return loss


if __name__ == "__main__":
    key = jax.random.PRNGKey(0)
    k_out, k_outi, k_loss = jax.random.split(key, 3)

    B, L = 8, 16          # batch_size x output_size
    K_NEG = 4             # num_negatives (reference default is 100; kept <= #negatives here)

    # Deterministic 0/1 target: every row AND every column has >= 1 positive and
    # >= K_NEG negatives (the dual term samples positives per label over the batch axis).
    rows = jnp.arange(B)
    target = jnp.zeros((B, L), jnp.float32)
    target = target.at[rows, rows].set(1.0)
    target = target.at[rows, rows + B].set(1.0)
    target = target.at[rows, (rows + 3) % L].set(1.0)

    # cosine similarities in [-1, 1]
    output = jax.random.uniform(k_out, (B, L), minval=-1.0, maxval=1.0, dtype=jnp.float32)
    output_i = jax.random.uniform(k_outi, (B, L), minval=-1.0, maxval=1.0, dtype=jnp.float32)

    loss = triplet_loss_w_reg(k_loss, output, target, output_i,
                              margin=0.3, margin_min=0.0, margin_reg=0.1,
                              num_negatives=K_NEG, tau=0.1,
                              reg=0.1, dual=1.0, inter=1.0)
    loss = jax.block_until_ready(loss)
    print("KERNEL_OK")
</pallas_src>

<mosaic_0001>
module attributes {stable_mosaic.version = 11 : i64} {
  func.func @fused_kernel(%arg0: i32, %arg1: i32, %arg2: memref<8x16xf32, #tpu.memory_space<vmem>>, %arg3: memref<8x16xf32, #tpu.memory_space<vmem>>, %arg4: memref<8x16xf32, #tpu.memory_space<vmem>>, %arg5: memref<8x1xi32, #tpu.memory_space<vmem>>, %arg6: memref<8x1xi32, #tpu.memory_space<vmem>>, %arg7: memref<8x1xi32, #tpu.memory_space<vmem>>, %arg8: memref<1x128xf32, #tpu.memory_space<vmem>>, %arg9: memref<1x128xf32, #tpu.memory_space<vmem>>, %arg10: memref<1x128xf32, #tpu.memory_space<vmem>>, %arg11: memref<1x128xf32, #tpu.memory_space<vmem>>, %arg12: memref<1x128xf32, #tpu.memory_space<vmem>>, %arg13: memref<1x128xf32, #tpu.memory_space<vmem>>) attributes {dimension_semantics = [#tpu.dimension_semantics<parallel>, #tpu.dimension_semantics<arbitrary>], iteration_bounds = array<i64: 1, 1>, scalar_prefetch = 0 : i64, scratch_operands = 0 : i64, tpu.core_type = #tpu.core_type<tc>, window_params = [{transform_indices = @transform_0, window_bounds = array<i64: 8, 16>}, {transform_indices = @transform_1, window_bounds = array<i64: 8, 16>}, {transform_indices = @transform_2, window_bounds = array<i64: 8, 16>}, {transform_indices = @transform_3, window_bounds = array<i64: 8, 1>}, {transform_indices = @transform_4, window_bounds = array<i64: 8, 1>}, {transform_indices = @transform_5, window_bounds = array<i64: 8, 1>}, {transform_indices = @transform_6, window_bounds = array<i64: 1, 128>}, {transform_indices = @transform_7, window_bounds = array<i64: 1, 128>}, {transform_indices = @transform_8, window_bounds = array<i64: 1, 128>}, {transform_indices = @transform_9, window_bounds = array<i64: 1, 128>}, {transform_indices = @transform_10, window_bounds = array<i64: 1, 128>}, {transform_indices = @transform_11, window_bounds = array<i64: 1, 128>}]} {
    %c0_i32 = arith.constant 0 : i32
    %0 = arith.cmpi eq, %arg1, %c0_i32 : i32
    %1 = arith.extui %0 : i1 to i32
    %c0_i32_0 = arith.constant 0 : i32
    %2 = arith.cmpi ne, %1, %c0_i32_0 : i32
    scf.if %2 {
      %cst_158 = arith.constant 0.000000e+00 : f32
      %423 = vector.broadcast %cst_158 : f32 to vector<1x128xf32>
      %c0_159 = arith.constant 0 : index
      %c0_160 = arith.constant 0 : index
      %424 = vector.load %arg8[%c0_159, %c0_160] : memref<1x128xf32, #tpu.memory_space<vmem>>, vector<1x128xf32>
      tpu.vector_store %arg8[%c0_159, %c0_160], %423 {strides = array<i32>} : memref<1x128xf32, #tpu.memory_space<vmem>>, vector<1x128xf32>,
      %cst_161 = arith.constant 0.000000e+00 : f32
      %425 = vector.broadcast %cst_161 : f32 to vector<1x128xf32>
      %c0_162 = arith.constant 0 : index
      %c0_163 = arith.constant 0 : index
      %426 = vector.load %arg9[%c0_162, %c0_163] : memref<1x128xf32, #tpu.memory_space<vmem>>, vector<1x128xf32>
      tpu.vector_store %arg9[%c0_162, %c0_163], %425 {strides = array<i32>} : memref<1x128xf32, #tpu.memory_space<vmem>>, vector<1x128xf32>,
      %cst_164 = arith.constant 0.000000e+00 : f32
      %427 = vector.broadcast %cst_164 : f32 to vector<1x128xf32>
      %c0_165 = arith.constant 0 : index
      %c0_166 = arith.constant 0 : index
      %428 = vector.load %arg10[%c0_165, %c0_166] : memref<1x128xf32, #tpu.memory_space<vmem>>, vector<1x128xf32>
      tpu.vector_store %arg10[%c0_165, %c0_166], %427 {strides = array<i32>} : memref<1x128xf32, #tpu.memory_space<vmem>>, vector<1x128xf32>,
      %cst_167 = arith.constant 0.000000e+00 : f32
      %429 = vector.broadcast %cst_167 : f32 to vector<1x128xf32>
      %c0_168 = arith.constant 0 : index
      %c0_169 = arith.constant 0 : index
      %430 = vector.load %arg11[%c0_168, %c0_169] : memref<1x128xf32, #tpu.memory_space<vmem>>, vector<1x128xf32>
      tpu.vector_store %arg11[%c0_168, %c0_169], %429 {strides = array<i32>} : memref<1x128xf32, #tpu.memory_space<vmem>>, vector<1x128xf32>,
      %cst_170 = arith.constant 0.000000e+00 : f32
      %431 = vector.broadcast %cst_170 : f32 to vector<1x128xf32>
      %c0_171 = arith.constant 0 : index
      %c0_172 = arith.constant 0 : index
      %432 = vector.load %arg12[%c0_171, %c0_172] : memref<1x128xf32, #tpu.memory_space<vmem>>, vector<1x128xf32>
      tpu.vector_store %arg12[%c0_171, %c0_172], %431 {strides = array<i32>} : memref<1x128xf32, #tpu.memory_space<vmem>>, vector<1x128xf32>,
      %cst_173 = arith.constant 0.000000e+00 : f32
      %433 = vector.broadcast %cst_173 : f32 to vector<1x128xf32>
      %c0_174 = arith.constant 0 : index
      %c0_175 = arith.constant 0 : index
      %434 = vector.load %arg13[%c0_174, %c0_175] : memref<1x128xf32, #tpu.memory_space<vmem>>, vector<1x128xf32>
      tpu.vector_store %arg13[%c0_174, %c0_175], %433 {strides = array<i32>} : memref<1x128xf32, #tpu.memory_space<vmem>>, vector<1x128xf32>,
    } else {
    }
    %c0 = arith.constant 0 : index
    %c0_1 = arith.constant 0 : index
    %3 = vector.load %arg2[%c0, %c0_1] : memref<8x16xf32, #tpu.memory_space<vmem>>, vector<8x16xf32>
    %c0_2 = arith.constant 0 : index
    %c0_3 = arith.constant 0 : index
    %4 = vector.load %arg3[%c0_2, %c0_3] : memref<8x16xf32, #tpu.memory_space<vmem>>, vector<8x16xf32>
    %c0_4 = arith.constant 0 : index
    %c0_5 = arith.constant 0 : index
    %5 = vector.load %arg4[%c0_4, %c0_5] : memref<8x16xf32, #tpu.memory_space<vmem>>, vector<8x16xf32>
    %cst = arith.constant 0.000000e+00 : f32
    %6 = vector.broadcast %cst : f32 to vector<8x16xf32>
    %7 = arith.cmpf oeq, %5, %6 : vector<8x16xf32>
    %8 = tpu.iota {dimensions = array<i32: 1>} : vector<8x16xi32>
    %9 = tpu.iota {dimensions = array<i32: 0>} : vector<8x1xi32>
    %c1_i32 = arith.constant 1 : i32
    %10 = arith.muli %arg0, %c1_i32 : i32
    %11 = arith.addi %10, %arg1 : i32
    %c8_i32 = arith.constant 8 : i32
    %12 = arith.muli %11, %c8_i32 : i32
    %13 = vector.broadcast %12 : i32 to vector<8x1xi32>
    %14 = arith.addi %13, %9 : vector<8x1xi32>
    %c8_i32_6 = arith.constant 8 : i32
    %15 = vector.broadcast %c8_i32_6 : i32 to vector<8x1xi32>
    %16 = arith.cmpi slt, %14, %15 : vector<8x1xi32>
    %c0_7 = arith.constant 0 : index
    %c0_8 = arith.constant 0 : index
    %17 = vector.load %arg5[%c0_7, %c0_8] : memref<8x1xi32, #tpu.memory_space<vmem>>, vector<8x1xi32>
    %18 = vector.broadcast %17 : vector<8x1xi32> to vector<8x16xi32>
    %19 = arith.cmpi eq, %8, %18 : vector<8x16xi32>
    %cst_9 = arith.constant 0.000000e+00 : f32
    %20 = vector.broadcast %cst_9 : f32 to vector<8x16xf32>
    %21 = arith.select %19, %3, %20 : vector<8x16xi1>, vector<8x16xf32>
    %cst_10 = arith.constant dense<0.000000e+00> : vector<8xf32>
    %22 = vector.multi_reduction <add>, %21, %cst_10 [1] : vector<8x16xf32> to vector<8xf32>
    %23 = vector.shape_cast %22 : vector<8xf32> to vector<8x1xf32>
    %c0_11 = arith.constant 0 : index
    %c0_12 = arith.constant 0 : index
    %24 = vector.load %arg6[%c0_11, %c0_12] : memref<8x1xi32, #tpu.memory_space<vmem>>, vector<8x1xi32>
    %25 = vector.broadcast %24 : vector<8x1xi32> to vector<8x16xi32>
    %26 = arith.cmpi eq, %8, %25 : vector<8x16xi32>
    %cst_13 = arith.constant 0.000000e+00 : f32
    %27 = vector.broadcast %cst_13 : f32 to vector<8x16xf32>
    %28 = arith.select %26, %4, %27 : vector<8x16xi1>, vector<8x16xf32>
    %cst_14 = arith.constant dense<0.000000e+00> : vector<8xf32>
    %29 = vector.multi_reduction <add>, %28, %cst_14 [1] : vector<8x16xf32> to vector<8xf32>
    %30 = vector.shape_cast %29 : vector<8xf32> to vector<8x1xf32>
    %c0_15 = arith.constant 0 : index
    %c0_16 = arith.constant 0 : index
    %31 = vector.load %arg7[%c0_15, %c0_16] : memref<8x1xi32, #tpu.memory_space<vmem>>, vector<8x1xi32>
    %32 = vector.broadcast %31 : vector<8x1xi32> to vector<8x16xi32>
    %33 = arith.cmpi eq, %8, %32 : vector<8x16xi32>
    %cst_17 = arith.constant 0.000000e+00 : f32
    %34 = vector.broadcast %cst_17 : f32 to vector<8x16xf32>
    %35 = arith.select %33, %3, %34 : vector<8x16xi1>, vector<8x16xf32>
    %cst_18 = arith.constant dense<0.000000e+00> : vector<8xf32>
    %36 = vector.multi_reduction <add>, %35, %cst_18 [1] : vector<8x16xf32> to vector<8xf32>
    %37 = vector.shape_cast %36 : vector<8xf32> to vector<8x1xf32>
    %cst_19 = arith.constant 0.000000e+00 : f32
    %38 = vector.broadcast %cst_19 : f32 to vector<8x16xf32>
    %39 = arith.select %33, %4, %38 : vector<8x16xi1>, vector<8x16xf32>
    %cst_20 = arith.constant dense<0.000000e+00> : vector<8xf32>
    %40 = vector.multi_reduction <add>, %39, %cst_20 [1] : vector<8x16xf32> to vector<8xf32>
    %41 = vector.shape_cast %40 : vector<8xf32> to vector<8x1xf32>
    %42 = arith.subf %41, %37 : vector<8x1xf32>
    %cst_21 = arith.constant 1.000000e-01 : f32
    %43 = vector.broadcast %cst_21 : f32 to vector<8x1xf32>
    %44 = arith.addf %42, %43 : vector<8x1xf32>
    %cst_22 = arith.constant 0.000000e+00 : f32
    %45 = vector.broadcast %cst_22 : f32 to vector<8x1xf32>
    %46 = arith.maximumf %45, %44 : vector<8x1xf32>
    %cst_23 = arith.constant 0.000000e+00 : f32
    %47 = vector.broadcast %cst_23 : f32 to vector<8x1xf32>
    %48 = arith.select %16, %46, %47 : vector<8x1xi1>, vector<8x1xf32>
    %c0_24 = arith.constant 0 : index
    %c0_25 = arith.constant 0 : index
    %49 = vector.load %arg10[%c0_24, %c0_25] : memref<1x128xf32, #tpu.memory_space<vmem>>, vector<1x128xf32>
    %cst_26 = arith.constant dense<0.000000e+00> : vector<1xf32>
    %50 = vector.multi_reduction <add>, %48, %cst_26 [0] : vector<8x1xf32> to vector<1xf32>
    %51 = vector.shape_cast %50 : vector<1xf32> to vector<1x1xf32>
    %52 = vector.broadcast %51 : vector<1x1xf32> to vector<1x128xf32>
    %53 = arith.addf %49, %52 : vector<1x128xf32>
    %c0_27 = arith.constant 0 : index
    %c0_28 = arith.constant 0 : index
    %54 = vector.load %arg10[%c0_27, %c0_28] : memref<1x128xf32, #tpu.memory_space<vmem>>, vector<1x128xf32>
    tpu.vector_store %arg10[%c0_27, %c0_28], %53 {strides = array<i32>} : memref<1x128xf32, #tpu.memory_space<vmem>>, vector<1x128xf32>,
    %c0_29 = arith.constant 0 : index
    %c0_30 = arith.constant 0 : index
    %55 = vector.load %arg11[%c0_29, %c0_30] : memref<1x128xf32, #tpu.memory_space<vmem>>, vector<1x128xf32>
    %cst_31 = arith.constant 0.000000e+00 : f32
    %56 = vector.broadcast %cst_31 : f32 to vector<8x1xf32>
    %57 = arith.cmpf ogt, %48, %56 : vector<8x1xf32>
    %58 = arith.extui %57 : vector<8x1xi1> to vector<8x1xi32>
    %59 = arith.sitofp %58 : vector<8x1xi32> to vector<8x1xf32>
    %cst_32 = arith.constant dense<0.000000e+00> : vector<1xf32>
    %60 = vector.multi_reduction <add>, %59, %cst_32 [0] : vector<8x1xf32> to vector<1xf32>
    %61 = vector.shape_cast %60 : vector<1xf32> to vector<1x1xf32>
    %62 = vector.broadcast %61 : vector<1x1xf32> to vector<1x128xf32>
    %63 = arith.addf %55, %62 : vector<1x128xf32>
    %c0_33 = arith.constant 0 : index
    %c0_34 = arith.constant 0 : index
    %64 = vector.load %arg11[%c0_33, %c0_34] : memref<1x128xf32, #tpu.memory_space<vmem>>, vector<1x128xf32>
    tpu.vector_store %arg11[%c0_33, %c0_34], %63 {strides = array<i32>} : memref<1x128xf32, #tpu.memory_space<vmem>>, vector<1x128xf32>,
    %cst_35 = arith.constant -1.000000e+02 : f32
    %65 = vector.broadcast %cst_35 : f32 to vector<8x16xf32>
    %66 = arith.select %7, %3, %65 : vector<8x16xi1>, vector<8x16xf32>
    %cst_36 = arith.constant -1.000000e+30 : f32
    %67 = vector.broadcast %cst_36 : f32 to vector<8x1xf32>
    %cst_37 = arith.constant 0.000000e+00 : f32
    %68 = vector.broadcast %cst_37 : f32 to vector<8x1xf32>
    %cst_38 = arith.constant 0.000000e+00 : f32
    %69 = vector.broadcast %cst_38 : f32 to vector<8x1xf32>
    %cst_39 = arith.constant 0.000000e+00 : f32
    %70 = vector.broadcast %cst_39 : f32 to vector<1x1xf32>
    %cst_40 = arith.constant 0.000000e+00 : f32
    %71 = vector.broadcast %cst_40 : f32 to vector<1x1xf32>
    %cst_41 = arith.constant dense<0xFF800000> : vector<8xf32>
    %72 = vector.multi_reduction <maximumf>, %66, %cst_41 [1] : vector<8x16xf32> to vector<8xf32>
    %73 = vector.shape_cast %72 : vector<8xf32> to vector<8x1xf32>
    %74 = vector.broadcast %73 : vector<8x1xf32> to vector<8x16xf32>
    %75 = arith.cmpf oeq, %66, %74 : vector<8x16xf32>
    %c16_i32 = arith.constant 16 : i32
    %76 = vector.broadcast %c16_i32 : i32 to vector<8x16xi32>
    %77 = arith.select %75, %8, %76 : vector<8x16xi1>, vector<8x16xi32>
    %cst_42 = arith.constant dense<2147483647> : vector<8xi32>
    %78 = vector.multi_reduction <minsi>, %77, %cst_42 [1] : vector<8x16xi32> to vector<8xi32>
    %79 = vector.shape_cast %78 : vector<8xi32> to vector<8x1xi32>
    %80 = vector.broadcast %79 : vector<8x1xi32> to vector<8x16xi32>
    %81 = arith.cmpi eq, %8, %80 : vector<8x16xi32>
    %82 = arith.subf %73, %23 : vector<8x1xf32>
    %cst_43 = arith.constant 3.000000e-01 : f32
    %83 = vector.broadcast %cst_43 : f32 to vector<8x1xf32>
    %84 = arith.addf %82, %83 : vector<8x1xf32>
    %cst_44 = arith.constant 0.000000e+00 : f32
    %85 = vector.broadcast %cst_44 : f32 to vector<8x1xf32>
    %86 = arith.maximumf %85, %84 : vector<8x1xf32>
    %cst_45 = arith.constant 0.000000e+00 : f32
    %87 = vector.broadcast %cst_45 : f32 to vector<8x1xf32>
    %88 = arith.cmpf oeq, %86, %87 : vector<8x1xf32>
    %cst_46 = arith.constant -1.000000e+02 : f32
    %89 = vector.broadcast %cst_46 : f32 to vector<8x1xf32>
    %90 = arith.select %88, %89, %73 : vector<8x1xi1>, vector<8x1xf32>
    %cst_47 = arith.constant 1.000000e+01 : f32
    %91 = vector.broadcast %cst_47 : f32 to vector<8x1xf32>
    %92 = arith.mulf %90, %91 : vector<8x1xf32>
    %93 = arith.maximumf %67, %92 : vector<8x1xf32>
    %94 = arith.subf %67, %93 : vector<8x1xf32>
    %95 = math.exp %94 : vector<8x1xf32>
    %96 = arith.subf %92, %93 : vector<8x1xf32>
    %97 = math.exp %96 : vector<8x1xf32>
    %cst_48 = arith.constant 0.000000e+00 : f32
    %98 = vector.broadcast %cst_48 : f32 to vector<8x16xf32>
    %99 = arith.select %81, %4, %98 : vector<8x16xi1>, vector<8x16xf32>
    %cst_49 = arith.constant dense<0.000000e+00> : vector<8xf32>
    %100 = vector.multi_reduction <add>, %99, %cst_49 [1] : vector<8x16xf32> to vector<8xf32>
    %101 = vector.shape_cast %100 : vector<8xf32> to vector<8x1xf32>
    %102 = arith.subf %73, %101 : vector<8x1xf32>
    %cst_50 = arith.constant 1.000000e-01 : f32
    %103 = vector.broadcast %cst_50 : f32 to vector<8x1xf32>
    %104 = arith.addf %102, %103 : vector<8x1xf32>
    %cst_51 = arith.constant 0.000000e+00 : f32
    %105 = vector.broadcast %cst_51 : f32 to vector<8x1xf32>
    %106 = arith.maximumf %105, %104 : vector<8x1xf32>
    %cst_52 = arith.constant 0.000000e+00 : f32
    %107 = vector.broadcast %cst_52 : f32 to vector<8x1xf32>
    %108 = arith.select %16, %106, %107 : vector<8x1xi1>, vector<8x1xf32>
    %cst_53 = arith.constant -1.000000e+30 : f32
    %109 = vector.broadcast %cst_53 : f32 to vector<8x16xf32>
    %110 = arith.select %81, %109, %66 : vector<8x16xi1>, vector<8x16xf32>
    %111 = arith.mulf %95, %68 : vector<8x1xf32>
    %112 = arith.addf %111, %97 : vector<8x1xf32>
    %113 = arith.mulf %95, %69 : vector<8x1xf32>
    %114 = arith.mulf %86, %97 : vector<8x1xf32>
    %115 = arith.addf %113, %114 : vector<8x1xf32>
    %cst_54 = arith.constant dense<0.000000e+00> : vector<1xf32>
    %116 = vector.multi_reduction <add>, %108, %cst_54 [0] : vector<8x1xf32> to vector<1xf32>
    %117 = vector.shape_cast %116 : vector<1xf32> to vector<1x1xf32>
    %118 = arith.addf %70, %117 : vector<1x1xf32>
    %cst_55 = arith.constant 0.000000e+00 : f32
    %119 = vector.broadcast %cst_55 : f32 to vector<8x1xf32>
    %120 = arith.cmpf ogt, %108, %119 : vector<8x1xf32>
    %121 = arith.extui %120 : vector<8x1xi1> to vector<8x1xi32>
    %122 = arith.sitofp %121 : vector<8x1xi32> to vector<8x1xf32>
    %cst_56 = arith.constant dense<0.000000e+00> : vector<1xf32>
    %123 = vector.multi_reduction <add>, %122, %cst_56 [0] : vector<8x1xf32> to vector<1xf32>
    %124 = vector.shape_cast %123 : vector<1xf32> to vector<1x1xf32>
    %125 = arith.addf %71, %124 : vector<1x1xf32>
    %cst_57 = arith.constant dense<0xFF800000> : vector<8xf32>
    %126 = vector.multi_reduction <maximumf>, %110, %cst_57 [1] : vector<8x16xf32> to vector<8xf32>
    %127 = vector.shape_cast %126 : vector<8xf32> to vector<8x1xf32>
    %128 = vector.broadcast %127 : vector<8x1xf32> to vector<8x16xf32>
    %129 = arith.cmpf oeq, %110, %128 : vector<8x16xf32>
    %c16_i32_58 = arith.constant 16 : i32
    %130 = vector.broadcast %c16_i32_58 : i32 to vector<8x16xi32>
    %131 = arith.select %129, %8, %130 : vector<8x16xi1>, vector<8x16xi32>
    %cst_59 = arith.constant dense<2147483647> : vector<8xi32>
    %132 = vector.multi_reduction <minsi>, %131, %cst_59 [1] : vector<8x16xi32> to vector<8xi32>
    %133 = vector.shape_cast %132 : vector<8xi32> to vector<8x1xi32>
    %134 = vector.broadcast %133 : vector<8x1xi32> to vector<8x16xi32>
    %135 = arith.cmpi eq, %8, %134 : vector<8x16xi32>
    %136 = arith.subf %127, %23 : vector<8x1xf32>
    %cst_60 = arith.constant 3.000000e-01 : f32
    %137 = vector.broadcast %cst_60 : f32 to vector<8x1xf32>
    %138 = arith.addf %136, %137 : vector<8x1xf32>
    %cst_61 = arith.constant 0.000000e+00 : f32
    %139 = vector.broadcast %cst_61 : f32 to vector<8x1xf32>
    %140 = arith.maximumf %139, %138 : vector<8x1xf32>
    %cst_62 = arith.constant 0.000000e+00 : f32
    %141 = vector.broadcast %cst_62 : f32 to vector<8x1xf32>
    %142 = arith.cmpf oeq, %140, %141 : vector<8x1xf32>
    %cst_63 = arith.constant -1.000000e+02 : f32
    %143 = vector.broadcast %cst_63 : f32 to vector<8x1xf32>
    %144 = arith.select %142, %143, %127 : vector<8x1xi1>, vector<8x1xf32>
    %cst_64 = arith.constant 1.000000e+01 : f32
    %145 = vector.broadcast %cst_64 : f32 to vector<8x1xf32>
    %146 = arith.mulf %144, %145 : vector<8x1xf32>
    %147 = arith.maximumf %93, %146 : vector<8x1xf32>
    %148 = arith.subf %93, %147 : vector<8x1xf32>
    %149 = math.exp %148 : vector<8x1xf32>
    %150 = arith.subf %146, %147 : vector<8x1xf32>
    %151 = math.exp %150 : vector<8x1xf32>
    %cst_65 = arith.constant 0.000000e+00 : f32
    %152 = vector.broadcast %cst_65 : f32 to vector<8x16xf32>
    %153 = arith.select %135, %4, %152 : vector<8x16xi1>, vector<8x16xf32>
    %cst_66 = arith.constant dense<0.000000e+00> : vector<8xf32>
    %154 = vector.multi_reduction <add>, %153, %cst_66 [1] : vector<8x16xf32> to vector<8xf32>
    %155 = vector.shape_cast %154 : vector<8xf32> to vector<8x1xf32>
    %156 = arith.subf %127, %155 : vector<8x1xf32>
    %cst_67 = arith.constant 1.000000e-01 : f32
    %157 = vector.broadcast %cst_67 : f32 to vector<8x1xf32>
    %158 = arith.addf %156, %157 : vector<8x1xf32>
    %cst_68 = arith.constant 0.000000e+00 : f32
    %159 = vector.broadcast %cst_68 : f32 to vector<8x1xf32>
    %160 = arith.maximumf %159, %158 : vector<8x1xf32>
    %cst_69 = arith.constant 0.000000e+00 : f32
    %161 = vector.broadcast %cst_69 : f32 to vector<8x1xf32>
    %162 = arith.select %16, %160, %161 : vector<8x1xi1>, vector<8x1xf32>
    %cst_70 = arith.constant -1.000000e+30 : f32
    %163 = vector.broadcast %cst_70 : f32 to vector<8x16xf32>
    %164 = arith.select %135, %163, %110 : vector<8x16xi1>, vector<8x16xf32>
    %165 = arith.mulf %149, %112 : vector<8x1xf32>
    %166 = arith.addf %165, %151 : vector<8x1xf32>
    %167 = arith.mulf %149, %115 : vector<8x1xf32>
    %168 = arith.mulf %140, %151 : vector<8x1xf32>
    %169 = arith.addf %167, %168 : vector<8x1xf32>
    %cst_71 = arith.constant dense<0.000000e+00> : vector<1xf32>
    %170 = vector.multi_reduction <add>, %162, %cst_71 [0] : vector<8x1xf32> to vector<1xf32>
    %171 = vector.shape_cast %170 : vector<1xf32> to vector<1x1xf32>
    %172 = arith.addf %118, %171 : vector<1x1xf32>
    %cst_72 = arith.constant 0.000000e+00 : f32
    %173 = vector.broadcast %cst_72 : f32 to vector<8x1xf32>
    %174 = arith.cmpf ogt, %162, %173 : vector<8x1xf32>
    %175 = arith.extui %174 : vector<8x1xi1> to vector<8x1xi32>
    %176 = arith.sitofp %175 : vector<8x1xi32> to vector<8x1xf32>
    %cst_73 = arith.constant dense<0.000000e+00> : vector<1xf32>
    %177 = vector.multi_reduction <add>, %176, %cst_73 [0] : vector<8x1xf32> to vector<1xf32>
    %178 = vector.shape_cast %177 : vector<1xf32> to vector<1x1xf32>
    %179 = arith.addf %125, %178 : vector<1x1xf32>
    %cst_74 = arith.constant dense<0xFF800000> : vector<8xf32>
    %180 = vector.multi_reduction <maximumf>, %164, %cst_74 [1] : vector<8x16xf32> to vector<8xf32>
    %181 = vector.shape_cast %180 : vector<8xf32> to vector<8x1xf32>
    %182 = vector.broadcast %181 : vector<8x1xf32> to vector<8x16xf32>
    %183 = arith.cmpf oeq, %164, %182 : vector<8x16xf32>
    %c16_i32_75 = arith.constant 16 : i32
    %184 = vector.broadcast %c16_i32_75 : i32 to vector<8x16xi32>
    %185 = arith.select %183, %8, %184 : vector<8x16xi1>, vector<8x16xi32>
    %cst_76 = arith.constant dense<2147483647> : vector<8xi32>
    %186 = vector.multi_reduction <minsi>, %185, %cst_76 [1] : vector<8x16xi32> to vector<8xi32>
    %187 = vector.shape_cast %186 : vector<8xi32> to vector<8x1xi32>
    %188 = vector.broadcast %187 : vector<8x1xi32> to vector<8x16xi32>
    %189 = arith.cmpi eq, %8, %188 : vector<8x16xi32>
    %190 = arith.subf %181, %23 : vector<8x1xf32>
    %cst_77 = arith.constant 3.000000e-01 : f32
    %191 = vector.broadcast %cst_77 : f32 to vector<8x1xf32>
    %192 = arith.addf %190, %191 : vector<8x1xf32>
    %cst_78 = arith.constant 0.000000e+00 : f32
    %193 = vector.broadcast %cst_78 : f32 to vector<8x1xf32>
    %194 = arith.maximumf %193, %192 : vector<8x1xf32>
    %cst_79 = arith.constant 0.000000e+00 : f32
    %195 = vector.broadcast %cst_79 : f32 to vector<8x1xf32>
    %196 = arith.cmpf oeq, %194, %195 : vector<8x1xf32>
    %cst_80 = arith.constant -1.000000e+02 : f32
    %197 = vector.broadcast %cst_80 : f32 to vector<8x1xf32>
    %198 = arith.select %196, %197, %181 : vector<8x1xi1>, vector<8x1xf32>
    %cst_81 = arith.constant 1.000000e+01 : f32
    %199 = vector.broadcast %cst_81 : f32 to vector<8x1xf32>
    %200 = arith.mulf %198, %199 : vector<8x1xf32>
    %201 = arith.maximumf %147, %200 : vector<8x1xf32>
    %202 = arith.subf %147, %201 : vector<8x1xf32>
    %203 = math.exp %202 : vector<8x1xf32>
    %204 = arith.subf %200, %201 : vector<8x1xf32>
    %205 = math.exp %204 : vector<8x1xf32>
    %cst_82 = arith.constant 0.000000e+00 : f32
    %206 = vector.broadcast %cst_82 : f32 to vector<8x16xf32>
    %207 = arith.select %189, %4, %206 : vector<8x16xi1>, vector<8x16xf32>
    %cst_83 = arith.constant dense<0.000000e+00> : vector<8xf32>
    %208 = vector.multi_reduction <add>, %207, %cst_83 [1] : vector<8x16xf32> to vector<8xf32>
    %209 = vector.shape_cast %208 : vector<8xf32> to vector<8x1xf32>
    %210 = arith.subf %181, %209 : vector<8x1xf32>
    %cst_84 = arith.constant 1.000000e-01 : f32
    %211 = vector.broadcast %cst_84 : f32 to vector<8x1xf32>
    %212 = arith.addf %210, %211 : vector<8x1xf32>
    %cst_85 = arith.constant 0.000000e+00 : f32
    %213 = vector.broadcast %cst_85 : f32 to vector<8x1xf32>
    %214 = arith.maximumf %213, %212 : vector<8x1xf32>
    %cst_86 = arith.constant 0.000000e+00 : f32
    %215 = vector.broadcast %cst_86 : f32 to vector<8x1xf32>
    %216 = arith.select %16, %214, %215 : vector<8x1xi1>, vector<8x1xf32>
    %cst_87 = arith.constant -1.000000e+30 : f32
    %217 = vector.broadcast %cst_87 : f32 to vector<8x16xf32>
    %218 = arith.select %189, %217, %164 : vector<8x16xi1>, vector<8x16xf32>
    %219 = arith.mulf %203, %166 : vector<8x1xf32>
    %220 = arith.addf %219, %205 : vector<8x1xf32>
    %221 = arith.mulf %203, %169 : vector<8x1xf32>
    %222 = arith.mulf %194, %205 : vector<8x1xf32>
    %223 = arith.addf %221, %222 : vector<8x1xf32>
    %cst_88 = arith.constant dense<0.000000e+00> : vector<1xf32>
    %224 = vector.multi_reduction <add>, %216, %cst_88 [0] : vector<8x1xf32> to vector<1xf32>
    %225 = vector.shape_cast %224 : vector<1xf32> to vector<1x1xf32>
    %226 = arith.addf %172, %225 : vector<1x1xf32>
    %cst_89 = arith.constant 0.000000e+00 : f32
    %227 = vector.broadcast %cst_89 : f32 to vector<8x1xf32>
    %228 = arith.cmpf ogt, %216, %227 : vector<8x1xf32>
    %229 = arith.extui %228 : vector<8x1xi1> to vector<8x1xi32>
    %230 = arith.sitofp %229 : vector<8x1xi32> to vector<8x1xf32>
    %cst_90 = arith.constant dense<0.000000e+00> : vector<1xf32>
    %231 = vector.multi_reduction <add>, %230, %cst_90 [0] : vector<8x1xf32> to vector<1xf32>
    %232 = vector.shape_cast %231 : vector<1xf32> to vector<1x1xf32>
    %233 = arith.addf %179, %232 : vector<1x1xf32>
    %cst_91 = arith.constant dense<0xFF800000> : vector<8xf32>
    %234 = vector.multi_reduction <maximumf>, %218, %cst_91 [1] : vector<8x16xf32> to vector<8xf32>
    %235 = vector.shape_cast %234 : vector<8xf32> to vector<8x1xf32>
    %236 = vector.broadcast %235 : vector<8x1xf32> to vector<8x16xf32>
    %237 = arith.cmpf oeq, %218, %236 : vector<8x16xf32>
    %c16_i32_92 = arith.constant 16 : i32
    %238 = vector.broadcast %c16_i32_92 : i32 to vector<8x16xi32>
    %239 = arith.select %237, %8, %238 : vector<8x16xi1>, vector<8x16xi32>
    %cst_93 = arith.constant dense<2147483647> : vector<8xi32>
    %240 = vector.multi_reduction <minsi>, %239, %cst_93 [1] : vector<8x16xi32> to vector<8xi32>
    %241 = vector.shape_cast %240 : vector<8xi32> to vector<8x1xi32>
    %242 = vector.broadcast %241 : vector<8x1xi32> to vector<8x16xi32>
    %243 = arith.cmpi eq, %8, %242 : vector<8x16xi32>
    %244 = arith.subf %235, %23 : vector<8x1xf32>
    %cst_94 = arith.constant 3.000000e-01 : f32
    %245 = vector.broadcast %cst_94 : f32 to vector<8x1xf32>
    %246 = arith.addf %244, %245 : vector<8x1xf32>
    %cst_95 = arith.constant 0.000000e+00 : f32
    %247 = vector.broadcast %cst_95 : f32 to vector<8x1xf32>
    %248 = arith.maximumf %247, %246 : vector<8x1xf32>
    %cst_96 = arith.constant 0.000000e+00 : f32
    %249 = vector.broadcast %cst_96 : f32 to vector<8x1xf32>
    %250 = arith.cmpf oeq, %248, %249 : vector<8x1xf32>
    %cst_97 = arith.constant -1.000000e+02 : f32
    %251 = vector.broadcast %cst_97 : f32 to vector<8x1xf32>
    %252 = arith.select %250, %251, %235 : vector<8x1xi1>, vector<8x1xf32>
    %cst_98 = arith.constant 1.000000e+01 : f32
    %253 = vector.broadcast %cst_98 : f32 to vector<8x1xf32>
    %254 = arith.mulf %252, %253 : vector<8x1xf32>
    %255 = arith.maximumf %201, %254 : vector<8x1xf32>
    %256 = arith.subf %201, %255 : vector<8x1xf32>
    %257 = math.exp %256 : vector<8x1xf32>
    %258 = arith.subf %254, %255 : vector<8x1xf32>
    %259 = math.exp %258 : vector<8x1xf32>
    %cst_99 = arith.constant 0.000000e+00 : f32
    %260 = vector.broadcast %cst_99 : f32 to vector<8x16xf32>
    %261 = arith.select %243, %4, %260 : vector<8x16xi1>, vector<8x16xf32>
    %cst_100 = arith.constant dense<0.000000e+00> : vector<8xf32>
    %262 = vector.multi_reduction <add>, %261, %cst_100 [1] : vector<8x16xf32> to vector<8xf32>
    %263 = vector.shape_cast %262 : vector<8xf32> to vector<8x1xf32>
    %264 = arith.subf %235, %263 : vector<8x1xf32>
    %cst_101 = arith.constant 1.000000e-01 : f32
    %265 = vector.broadcast %cst_101 : f32 to vector<8x1xf32>
    %266 = arith.addf %264, %265 : vector<8x1xf32>
    %cst_102 = arith.constant 0.000000e+00 : f32
    %267 = vector.broadcast %cst_102 : f32 to vector<8x1xf32>
    %268 = arith.maximumf %267, %266 : vector<8x1xf32>
    %cst_103 = arith.constant 0.000000e+00 : f32
    %269 = vector.broadcast %cst_103 : f32 to vector<8x1xf32>
    %270 = arith.select %16, %268, %269 : vector<8x1xi1>, vector<8x1xf32>
    %271 = arith.mulf %257, %220 : vector<8x1xf32>
    %272 = arith.addf %271, %259 : vector<8x1xf32>
    %273 = arith.mulf %257, %223 : vector<8x1xf32>
    %274 = arith.mulf %248, %259 : vector<8x1xf32>
    %275 = arith.addf %273, %274 : vector<8x1xf32>
    %cst_104 = arith.constant dense<0.000000e+00> : vector<1xf32>
    %276 = vector.multi_reduction <add>, %270, %cst_104 [0] : vector<8x1xf32> to vector<1xf32>
    %277 = vector.shape_cast %276 : vector<1xf32> to vector<1x1xf32>
    %278 = arith.addf %226, %277 : vector<1x1xf32>
    %cst_105 = arith.constant 0.000000e+00 : f32
    %279 = vector.broadcast %cst_105 : f32 to vector<8x1xf32>
    %280 = arith.cmpf ogt, %270, %279 : vector<8x1xf32>
    %281 = arith.extui %280 : vector<8x1xi1> to vector<8x1xi32>
    %282 = arith.sitofp %281 : vector<8x1xi32> to vector<8x1xf32>
    %cst_106 = arith.constant dense<0.000000e+00> : vector<1xf32>
    %283 = vector.multi_reduction <add>, %282, %cst_106 [0] : vector<8x1xf32> to vector<1xf32>
    %284 = vector.shape_cast %283 : vector<1xf32> to vector<1x1xf32>
    %285 = arith.addf %233, %284 : vector<1x1xf32>
    %286 = tpu.reciprocal %272 {approx = true} : vector<8x1xf32> -> vector<8x1xf32>
    %287 = arith.mulf %275, %286 : vector<8x1xf32>
    %cst_107 = arith.constant 0.000000e+00 : f32
    %288 = vector.broadcast %cst_107 : f32 to vector<8x1xf32>
    %289 = arith.select %16, %287, %288 : vector<8x1xi1>, vector<8x1xf32>
    %c0_108 = arith.constant 0 : index
    %c0_109 = arith.constant 0 : index
    %290 = vector.load %arg8[%c0_108, %c0_109] : memref<1x128xf32, #tpu.memory_space<vmem>>, vector<1x128xf32>
    %cst_110 = arith.constant dense<0.000000e+00> : vector<1xf32>
    %291 = vector.multi_reduction <add>, %289, %cst_110 [0] : vector<8x1xf32> to vector<1xf32>
    %292 = vector.shape_cast %291 : vector<1xf32> to vector<1x1xf32>
    %293 = vector.broadcast %292 : vector<1x1xf32> to vector<1x128xf32>
    %294 = arith.addf %290, %293 : vector<1x128xf32>
    %c0_111 = arith.constant 0 : index
    %c0_112 = arith.constant 0 : index
    %295 = vector.load %arg8[%c0_111, %c0_112] : memref<1x128xf32, #tpu.memory_space<vmem>>, vector<1x128xf32>
    tpu.vector_store %arg8[%c0_111, %c0_112], %294 {strides = array<i32>} : memref<1x128xf32, #tpu.memory_space<vmem>>, vector<1x128xf32>,
    %c0_113 = arith.constant 0 : index
    %c0_114 = arith.constant 0 : index
    %296 = vector.load %arg12[%c0_113, %c0_114] : memref<1x128xf32, #tpu.memory_space<vmem>>, vector<1x128xf32>
    %297 = vector.broadcast %278 : vector<1x1xf32> to vector<1x128xf32>
    %298 = arith.addf %296, %297 : vector<1x128xf32>
    %c0_115 = arith.constant 0 : index
    %c0_116 = arith.constant 0 : index
    %299 = vector.load %arg12[%c0_115, %c0_116] : memref<1x128xf32, #tpu.memory_space<vmem>>, vector<1x128xf32>
    tpu.vector_store %arg12[%c0_115, %c0_116], %298 {strides = array<i32>} : memref<1x128xf32, #tpu.memory_space<vmem>>, vector<1x128xf32>,
    %c0_117 = arith.constant 0 : index
    %c0_118 = arith.constant 0 : index
    %300 = vector.load %arg13[%c0_117, %c0_118] : memref<1x128xf32, #tpu.memory_space<vmem>>, vector<1x128xf32>
    %301 = vector.broadcast %285 : vector<1x1xf32> to vector<1x128xf32>
    %302 = arith.addf %300, %301 : vector<1x128xf32>
    %c0_119 = arith.constant 0 : index
    %c0_120 = arith.constant 0 : index
    %303 = vector.load %arg13[%c0_119, %c0_120] : memref<1x128xf32, #tpu.memory_space<vmem>>, vector<1x128xf32>
    tpu.vector_store %arg13[%c0_119, %c0_120], %302 {strides = array<i32>} : memref<1x128xf32, #tpu.memory_space<vmem>>, vector<1x128xf32>,
    %cst_121 = arith.constant -1.000000e+02 : f32
    %304 = vector.broadcast %cst_121 : f32 to vector<8x16xf32>
    %305 = arith.select %7, %4, %304 : vector<8x16xi1>, vector<8x16xf32>
    %cst_122 = arith.constant -1.000000e+30 : f32
    %306 = vector.broadcast %cst_122 : f32 to vector<8x1xf32>
    %cst_123 = arith.constant 0.000000e+00 : f32
    %307 = vector.broadcast %cst_123 : f32 to vector<8x1xf32>
    %cst_124 = arith.constant 0.000000e+00 : f32
    %308 = vector.broadcast %cst_124 : f32 to vector<8x1xf32>
    %cst_125 = arith.constant dense<0xFF800000> : vector<8xf32>
    %309 = vector.multi_reduction <maximumf>, %305, %cst_125 [1] : vector<8x16xf32> to vector<8xf32>
    %310 = vector.shape_cast %309 : vector<8xf32> to vector<8x1xf32>
    %311 = arith.subf %310, %30 : vector<8x1xf32>
    %cst_126 = arith.constant 3.000000e-01 : f32
    %312 = vector.broadcast %cst_126 : f32 to vector<8x1xf32>
    %313 = arith.addf %311, %312 : vector<8x1xf32>
    %cst_127 = arith.constant 0.000000e+00 : f32
    %314 = vector.broadcast %cst_127 : f32 to vector<8x1xf32>
    %315 = arith.maximumf %314, %313 : vector<8x1xf32>
    %cst_128 = arith.constant 0.000000e+00 : f32
    %316 = vector.broadcast %cst_128 : f32 to vector<8x1xf32>
    %317 = arith.cmpf oeq, %315, %316 : vector<8x1xf32>
    %cst_129 = arith.constant -1.000000e+02 : f32
    %318 = vector.broadcast %cst_129 : f32 to vector<8x1xf32>
    %319 = arith.select %317, %318, %310 : vector<8x1xi1>, vector<8x1xf32>
    %cst_130 = arith.constant 1.000000e+01 : f32
    %320 = vector.broadcast %cst_130 : f32 to vector<8x1xf32>
    %321 = arith.mulf %319, %320 : vector<8x1xf32>
    %322 = arith.maximumf %306, %321 : vector<8x1xf32>
    %323 = arith.subf %306, %322 : vector<8x1xf32>
    %324 = math.exp %323 : vector<8x1xf32>
    %325 = arith.subf %321, %322 : vector<8x1xf32>
    %326 = math.exp %325 : vector<8x1xf32>
    %327 = vector.broadcast %310 : vector<8x1xf32> to vector<8x16xf32>
    %328 = arith.cmpf oeq, %305, %327 : vector<8x16xf32>
    %cst_131 = arith.constant -1.000000e+30 : f32
    %329 = vector.broadcast %cst_131 : f32 to vector<8x16xf32>
    %330 = arith.select %328, %329, %305 : vector<8x16xi1>, vector<8x16xf32>
    %331 = arith.mulf %324, %307 : vector<8x1xf32>
    %332 = arith.addf %331, %326 : vector<8x1xf32>
    %333 = arith.mulf %324, %308 : vector<8x1xf32>
    %334 = arith.mulf %315, %326 : vector<8x1xf32>
    %335 = arith.addf %333, %334 : vector<8x1xf32>
    %cst_132 = arith.constant dense<0xFF800000> : vector<8xf32>
    %336 = vector.multi_reduction <maximumf>, %330, %cst_132 [1] : vector<8x16xf32> to vector<8xf32>
    %337 = vector.shape_cast %336 : vector<8xf32> to vector<8x1xf32>
    %338 = arith.subf %337, %30 : vector<8x1xf32>
    %cst_133 = arith.constant 3.000000e-01 : f32
    %339 = vector.broadcast %cst_133 : f32 to vector<8x1xf32>
    %340 = arith.addf %338, %339 : vector<8x1xf32>
    %cst_134 = arith.constant 0.000000e+00 : f32
    %341 = vector.broadcast %cst_134 : f32 to vector<8x1xf32>
    %342 = arith.maximumf %341, %340 : vector<8x1xf32>
    %cst_135 = arith.constant 0.000000e+00 : f32
    %343 = vector.broadcast %cst_135 : f32 to vector<8x1xf32>
    %344 = arith.cmpf oeq, %342, %343 : vector<8x1xf32>
    %cst_136 = arith.constant -1.000000e+02 : f32
    %345 = vector.broadcast %cst_136 : f32 to vector<8x1xf32>
    %346 = arith.select %344, %345, %337 : vector<8x1xi1>, vector<8x1xf32>
    %cst_137 = arith.constant 1.000000e+01 : f32
    %347 = vector.broadcast %cst_137 : f32 to vector<8x1xf32>
    %348 = arith.mulf %346, %347 : vector<8x1xf32>
    %349 = arith.maximumf %322, %348 : vector<8x1xf32>
    %350 = arith.subf %322, %349 : vector<8x1xf32>
    %351 = math.exp %350 : vector<8x1xf32>
    %352 = arith.subf %348, %349 : vector<8x1xf32>
    %353 = math.exp %352 : vector<8x1xf32>
    %354 = vector.broadcast %337 : vector<8x1xf32> to vector<8x16xf32>
    %355 = arith.cmpf oeq, %330, %354 : vector<8x16xf32>
    %cst_138 = arith.constant -1.000000e+30 : f32
    %356 = vector.broadcast %cst_138 : f32 to vector<8x16xf32>
    %357 = arith.select %355, %356, %330 : vector<8x16xi1>, vector<8x16xf32>
    %358 = arith.mulf %351, %332 : vector<8x1xf32>
    %359 = arith.addf %358, %353 : vector<8x1xf32>
    %360 = arith.mulf %351, %335 : vector<8x1xf32>
    %361 = arith.mulf %342, %353 : vector<8x1xf32>
    %362 = arith.addf %360, %361 : vector<8x1xf32>
    %cst_139 = arith.constant dense<0xFF800000> : vector<8xf32>
    %363 = vector.multi_reduction <maximumf>, %357, %cst_139 [1] : vector<8x16xf32> to vector<8xf32>
    %364 = vector.shape_cast %363 : vector<8xf32> to vector<8x1xf32>
    %365 = arith.subf %364, %30 : vector<8x1xf32>
    %cst_140 = arith.constant 3.000000e-01 : f32
    %366 = vector.broadcast %cst_140 : f32 to vector<8x1xf32>
    %367 = arith.addf %365, %366 : vector<8x1xf32>
    %cst_141 = arith.constant 0.000000e+00 : f32
    %368 = vector.broadcast %cst_141 : f32 to vector<8x1xf32>
    %369 = arith.maximumf %368, %367 : vector<8x1xf32>
    %cst_142 = arith.constant 0.000000e+00 : f32
    %370 = vector.broadcast %cst_142 : f32 to vector<8x1xf32>
    %371 = arith.cmpf oeq, %369, %370 : vector<8x1xf32>
    %cst_143 = arith.constant -1.000000e+02 : f32
    %372 = vector.broadcast %cst_143 : f32 to vector<8x1xf32>
    %373 = arith.select %371, %372, %364 : vector<8x1xi1>, vector<8x1xf32>
    %cst_144 = arith.constant 1.000000e+01 : f32
    %374 = vector.broadcast %cst_144 : f32 to vector<8x1xf32>
    %375 = arith.mulf %373, %374 : vector<8x1xf32>
    %376 = arith.maximumf %349, %375 : vector<8x1xf32>
    %377 = arith.subf %349, %376 : vector<8x1xf32>
    %378 = math.exp %377 : vector<8x1xf32>
    %379 = arith.subf %375, %376 : vector<8x1xf32>
    %380 = math.exp %379 : vector<8x1xf32>
    %381 = vector.broadcast %364 : vector<8x1xf32> to vector<8x16xf32>
    %382 = arith.cmpf oeq, %357, %381 : vector<8x16xf32>
    %cst_145 = arith.constant -1.000000e+30 : f32
    %383 = vector.broadcast %cst_145 : f32 to vector<8x16xf32>
    %384 = arith.select %382, %383, %357 : vector<8x16xi1>, vector<8x16xf32>
    %385 = arith.mulf %378, %359 : vector<8x1xf32>
    %386 = arith.addf %385, %380 : vector<8x1xf32>
    %387 = arith.mulf %378, %362 : vector<8x1xf32>
    %388 = arith.mulf %369, %380 : vector<8x1xf32>
    %389 = arith.addf %387, %388 : vector<8x1xf32>
    %cst_146 = arith.constant dense<0xFF800000> : vector<8xf32>
    %390 = vector.multi_reduction <maximumf>, %384, %cst_146 [1] : vector<8x16xf32> to vector<8xf32>
    %391 = vector.shape_cast %390 : vector<8xf32> to vector<8x1xf32>
    %392 = arith.subf %391, %30 : vector<8x1xf32>
    %cst_147 = arith.constant 3.000000e-01 : f32
    %393 = vector.broadcast %cst_147 : f32 to vector<8x1xf32>
    %394 = arith.addf %392, %393 : vector<8x1xf32>
    %cst_148 = arith.constant 0.000000e+00 : f32
    %395 = vector.broadcast %cst_148 : f32 to vector<8x1xf32>
    %396 = arith.maximumf %395, %394 : vector<8x1xf32>
    %cst_149 = arith.constant 0.000000e+00 : f32
    %397 = vector.broadcast %cst_149 : f32 to vector<8x1xf32>
    %398 = arith.cmpf oeq, %396, %397 : vector<8x1xf32>
    %cst_150 = arith.constant -1.000000e+02 : f32
    %399 = vector.broadcast %cst_150 : f32 to vector<8x1xf32>
    %400 = arith.select %398, %399, %391 : vector<8x1xi1>, vector<8x1xf32>
    %cst_151 = arith.constant 1.000000e+01 : f32
    %401 = vector.broadcast %cst_151 : f32 to vector<8x1xf32>
    %402 = arith.mulf %400, %401 : vector<8x1xf32>
    %403 = arith.maximumf %376, %402 : vector<8x1xf32>
    %404 = arith.subf %376, %403 : vector<8x1xf32>
    %405 = math.exp %404 : vector<8x1xf32>
    %406 = arith.subf %402, %403 : vector<8x1xf32>
    %407 = math.exp %406 : vector<8x1xf32>
    %408 = arith.mulf %405, %386 : vector<8x1xf32>
    %409 = arith.addf %408, %407 : vector<8x1xf32>
    %410 = arith.mulf %405, %389 : vector<8x1xf32>
    %411 = arith.mulf %396, %407 : vector<8x1xf32>
    %412 = arith.addf %410, %411 : vector<8x1xf32>
    %413 = tpu.reciprocal %409 {approx = true} : vector<8x1xf32> -> vector<8x1xf32>
    %414 = arith.mulf %412, %413 : vector<8x1xf32>
    %c0_152 = arith.constant 0 : index
    %c0_153 = arith.constant 0 : index
    %415 = vector.load %arg9[%c0_152, %c0_153] : memref<1x128xf32, #tpu.memory_space<vmem>>, vector<1x128xf32>
    %cst_154 = arith.constant 0.000000e+00 : f32
    %416 = vector.broadcast %cst_154 : f32 to vector<8x1xf32>
    %417 = arith.select %16, %414, %416 : vector<8x1xi1>, vector<8x1xf32>
    %cst_155 = arith.constant dense<0.000000e+00> : vector<1xf32>
    %418 = vector.multi_reduction <add>, %417, %cst_155 [0] : vector<8x1xf32> to vector<1xf32>
    %419 = vector.shape_cast %418 : vector<1xf32> to vector<1x1xf32>
    %420 = vector.broadcast %419 : vector<1x1xf32> to vector<1x128xf32>
    %421 = arith.addf %415, %420 : vector<1x128xf32>
    %c0_156 = arith.constant 0 : index
    %c0_157 = arith.constant 0 : index
    %422 = vector.load %arg9[%c0_156, %c0_157] : memref<1x128xf32, #tpu.memory_space<vmem>>, vector<1x128xf32>
    tpu.vector_store %arg9[%c0_156, %c0_157], %421 {strides = array<i32>} : memref<1x128xf32, #tpu.memory_space<vmem>>, vector<1x128xf32>,
    return
  }
  func.func @transform_0(%arg0: i32, %arg1: i32) -> (i32, i32) {
    %c1_i32 = arith.constant 1 : i32
    %0 = arith.muli %arg0, %c1_i32 : i32
    %1 = arith.addi %0, %arg1 : i32
    %c0_i32 = arith.constant 0 : i32
    %2 = arith.minsi %1, %c0_i32 : i32
    %c0_i32_0 = arith.constant 0 : i32
    %c0_i32_1 = arith.constant 0 : i32
    return %2, %c0_i32_0 : i32, i32
  }
  func.func @transform_1(%arg0: i32, %arg1: i32) -> (i32, i32) {
    %c1_i32 = arith.constant 1 : i32
    %0 = arith.muli %arg0, %c1_i32 : i32
    %1 = arith.addi %0, %arg1 : i32
    %c0_i32 = arith.constant 0 : i32
    %2 = arith.minsi %1, %c0_i32 : i32
    %c0_i32_0 = arith.constant 0 : i32
    %c0_i32_1 = arith.constant 0 : i32
    return %2, %c0_i32_0 : i32, i32
  }
  func.func @transform_2(%arg0: i32, %arg1: i32) -> (i32, i32) {
    %c1_i32 = arith.constant 1 : i32
    %0 = arith.muli %arg0, %c1_i32 : i32
    %1 = arith.addi %0, %arg1 : i32
    %c0_i32 = arith.constant 0 : i32
    %2 = arith.minsi %1, %c0_i32 : i32
    %c0_i32_0 = arith.constant 0 : i32
    %c0_i32_1 = arith.constant 0 : i32
    return %2, %c0_i32_0 : i32, i32
  }
  func.func @transform_3(%arg0: i32, %arg1: i32) -> (i32, i32) {
    %c1_i32 = arith.constant 1 : i32
    %0 = arith.muli %arg0, %c1_i32 : i32
    %1 = arith.addi %0, %arg1 : i32
    %c0_i32 = arith.constant 0 : i32
    %2 = arith.minsi %1, %c0_i32 : i32
    %c0_i32_0 = arith.constant 0 : i32
    %c0_i32_1 = arith.constant 0 : i32
    return %2, %c0_i32_0 : i32, i32
  }
  func.func @transform_4(%arg0: i32, %arg1: i32) -> (i32, i32) {
    %c1_i32 = arith.constant 1 : i32
    %0 = arith.muli %arg0, %c1_i32 : i32
    %1 = arith.addi %0, %arg1 : i32
    %c0_i32 = arith.constant 0 : i32
    %2 = arith.minsi %1, %c0_i32 : i32
    %c0_i32_0 = arith.constant 0 : i32
    %c0_i32_1 = arith.constant 0 : i32
    return %2, %c0_i32_0 : i32, i32
  }
  func.func @transform_5(%arg0: i32, %arg1: i32) -> (i32, i32) {
    %c1_i32 = arith.constant 1 : i32
    %0 = arith.muli %arg0, %c1_i32 : i32
    %1 = arith.addi %0, %arg1 : i32
    %c0_i32 = arith.constant 0 : i32
    %2 = arith.minsi %1, %c0_i32 : i32
    %c0_i32_0 = arith.constant 0 : i32
    %c0_i32_1 = arith.constant 0 : i32
    return %2, %c0_i32_0 : i32, i32
  }
  func.func @transform_6(%arg0: i32, %arg1: i32) -> (i32, i32) {
    %c0_i32 = arith.constant 0 : i32
    %c0_i32_0 = arith.constant 0 : i32
    return %c0_i32, %arg0 : i32, i32
  }
  func.func @transform_7(%arg0: i32, %arg1: i32) -> (i32, i32) {
    %c0_i32 = arith.constant 0 : i32
    %c0_i32_0 = arith.constant 0 : i32
    return %c0_i32, %arg0 : i32, i32
  }
  func.func @transform_8(%arg0: i32, %arg1: i32) -> (i32, i32) {
    %c0_i32 = arith.constant 0 : i32
    %c0_i32_0 = arith.constant 0 : i32
    return %c0_i32, %arg0 : i32, i32
  }
  func.func @transform_9(%arg0: i32, %arg1: i32) -> (i32, i32) {
    %c0_i32 = arith.constant 0 : i32
    %c0_i32_0 = arith.constant 0 : i32
    return %c0_i32, %arg0 : i32, i32
  }
  func.func @transform_10(%arg0: i32, %arg1: i32) -> (i32, i32) {
    %c0_i32 = arith.constant 0 : i32
    %c0_i32_0 = arith.constant 0 : i32
    return %c0_i32, %arg0 : i32, i32
  }
  func.func @transform_11(%arg0: i32, %arg1: i32) -> (i32, i32) {
    %c0_i32 = arith.constant 0 : i32
    %c0_i32_0 = arith.constant 0 : i32
    return %c0_i32, %arg0 : i32, i32
  }
}

</mosaic_0001>

<bundles_post_ra>
// kernel: tpu_custom_call.1
= control target key start
LH: loop header
LB: loop body
LE: loop exit
PB: predicated region body
PF: predicated region fallthrough
CT: control target
= control target key end

     0   :  { %17 = vsyncpa [#allocation3], 0  ;;  %s1279_s0 = inlined_call_operand.vmem [shape: f32[8,16], index: 0, kind: input, shape index: {}]   ;;  %s1280_s1 = inlined_call_operand.vmem [shape: f32[8,16], index: 1, kind: input, shape index: {}]   ;;  %s1281_s2 = inlined_call_operand.vmem [shape: f32[8,16], index: 2, kind: input, shape index: {}]   ;;  %s1282_s3 = inlined_call_operand.vmem [shape: s32[8,1], index: 3, kind: input, shape index: {}]   ;;  %s1283_s4 = inlined_call_operand.vmem [shape: s32[8,1], index: 4, kind: input, shape index: {}]   ;;  %s1284_s5 = inlined_call_operand.vmem [shape: s32[8,1], index: 5, kind: input, shape index: {}]   ;;  %s1285_s6 = inlined_call_operand.hbm [shape: f32[1,128], index: 6, kind: output, shape index: {0}]   ;;  %s1286_s7 = inlined_call_operand.hbm [shape: f32[1,128], index: 7, kind: output, shape index: {1}]   ;;  %s1287_s8 = inlined_call_operand.hbm [shape: f32[1,128], index: 8, kind: output, shape index: {2}]   ;;  %s1288_s9 = inlined_call_operand.hbm [shape: f32[1,128], index: 9, kind: output, shape index: {3}]   ;;  %s1289_s10 = inlined_call_operand.hbm [shape: f32[1,128], index: 10, kind: output, shape index: {4}]   ;;  %s1290_s11 = inlined_call_operand.hbm [shape: f32[1,128], index: 11, kind: output, shape index: {5}]  }
   0x1   :  { %18 = vsyncpa [#allocation5], 0 }
   0x2   :  { %19 = vsyncpa [#allocation8], 0  ;;  %v1022_v0 = vld [vmem:[%s1279_s0] sm:$0xff]  ;;  %vm224_vm0 = vcmask 130048  }
   0x3   :  { %v207_v1 = vld [vmem:[%s1281_s2] sm:$0xff] }
   0x4   :  { %20 = vsyncpa [#allocation11], 0  ;;  %vm208_vm1 = vcmp.eq.f32.partialorder %v207_v1, 0.0  ;;  %v209_v4 = vlaneseq  ;;  %v1066_v42 = vld [vmem:[%s1280_s1] sm:$0xff]  ;;  %v951_v46 = vmov 0   ;;  %s954_s25 = smov [#allocation2]  }
   0x5   :  { %v275_v2 = vsel %vm208_vm1, %v1022_v0, -100.0  ;;  %v552_v44 = vsel %vm208_vm1, %v1066_v42, -100.0  ;;  %785 = vset.pattern.permute.xlu1 %v951_v46  ;;  %786 = vset.pattern.permute.xlu0 %v951_v46  ;;  %v228_v54 = vld [vmem:[%s1283_s4] sm:$0xff]  ;;  %s660_s26 = sshll.u32 %s954_s25, 4  ;;  %s661_s26 = int_to_ptr.vmem [resolvable:$true] %s660_s26 }
   0x6   :  { %v276_v3 = vsel %vm224_vm0, %v275_v2, -inf  ;;  %v1030_v5 = vand.u32 127, %v209_v4  ;;  %v553_v45 = vsel %vm224_vm0, %v552_v44, -inf }
   0x7   :  { %277 = vmax.xlane.f32.xlu0 %v276_v3 }
  0x90   :  { %v1032_v6 = vpop.xlane.xlu0 %277 }
  0x91   :  { %vm279_vm2 = vcmp.eq.f32.partialorder %v275_v2, %v1032_v6 }
  0x92   :  { %v280_v7 = vsel %vm279_vm2, %v1030_v5, 16 }
  0x93   :  { %v281_v8 = vsel %vm224_vm0, %v280_v7, 2147483647 }
  0x94   :  { %v283_v9 = vshra.s32 %v281_v8, 16  ;;  %v282_v11 = vand.u32 65535, %v281_v8 }
  0x96   :  { %v285_v10 = vcvt.s32.f32 %v283_v9  ;;  %v284_v13 = vcvt.s32.f32 %v282_v11 }
  0x98   :  { %286 = vmin.xlane.f32.xlu0 %v285_v10 }
 0x121   :  { %v287_v12 = vpop.xlane.xlu0 %286 }
 0x122   :  { %vm288_vm3 = vcmp.eq.f32.partialorder %v285_v10, %v287_v12  ;;  %v293_v15 = vcvt.f32.s32 %v287_v12 }
 0x123   :  { %v289_v14 = vsel %vm288_vm3, %v284_v13, inf  ;;  %v218_v13 = vld [vmem:[%s1282_s3] sm:$0xff]  ;;  %s953_s3 = smov [#allocation4]  }
 0x124   :  { %290 = vmin.xlane.f32.xlu1 %v289_v14  ;;  %v294_v17 = vshll.u32 %v293_v15, 16  ;;  %s670_s24 = sshll.u32 %s953_s3, 4  ;;  %s671_s24 = int_to_ptr.vmem [resolvable:$true] %s670_s24 }
 0x125   :  { %s823_s27 = scalar_lea.vmem %s671_s24, 16  ;;  %s827_s28 = scalar_lea.vmem %s671_s24, 32 }
 0x126   :  { %p824_p0 = scmp.ne.s32.totalorder %s671_s24, %s823_s27  ;;  %p828_p1 = scmp.lt.s32.totalorder %s671_s24, %s671_s24 }
 0x127   :  { %p829_p2 = scmp.lt.s32.totalorder %s827_s28, %s823_s27 }
 0x129   :  { %p830_p3 = por %p829_p2, %p828_p1 }
 0x12b   :  { %p831_p4 = pnand %p830_p3, %p824_p0 }
 0x1ad   :  { %v291_v16 = vpop.xlane.xlu1 %290 }
 0x1ae   :  { %v292_v18 = vcvt.f32.s32 %v291_v16 }
 0x1b0   :  { %v1037_v19 = vadd.s32 %v294_v17, %v292_v18 }
 0x1b2   :  { %vm296_vm4 = vcmp.eq.s32.totalorder %v1030_v5, %v1037_v19  ;;  %v952_v19 = vmov 0.0  }
 0x1b3   :  { %v318_v20 = vsel %vm296_vm4, -1e+30, %v275_v2  ;;  %v237_v2 = vld [vmem:[%s1284_s5] sm:$0xff]  ;;  %199 = vst [vmem:[#allocation2] sm:$0x1] %v952_v19 }
 0x1b4   :  { %v340_v21 = vsel %vm224_vm0, %v318_v20, -inf  ;;  %200 = vst [vmem:[#allocation4] sm:$0x1] %v952_v19  ;;  %201 = vst [vmem:[#allocation6] sm:$0x1] %v952_v19 }
 0x1b5   :  { %341 = vmax.xlane.f32.xlu1 %v340_v21  ;;  %202 = vst [vmem:[#allocation7] sm:$0x1] %v952_v19  ;;  %203 = vst [vmem:[#allocation9] sm:$0x1] %v952_v19 }
 0x1b6   :  { %204 = vst [vmem:[#allocation10] sm:$0x1] %v952_v19 }
 0x23e   :  { %v1045_v22 = vpop.xlane.xlu1 %341 }
 0x23f   :  { %vm343_vm5 = vcmp.eq.f32.partialorder %v318_v20, %v1045_v22 }
 0x240   :  { %v344_v23 = vsel %vm343_vm5, %v1030_v5, 16 }
 0x241   :  { %v345_v24 = vsel %vm224_vm0, %v344_v23, 2147483647 }
 0x242   :  { %v347_v25 = vshra.s32 %v345_v24, 16  ;;  %v346_v27 = vand.u32 65535, %v345_v24 }
 0x244   :  { %v349_v26 = vcvt.s32.f32 %v347_v25  ;;  %v348_v29 = vcvt.s32.f32 %v346_v27 }
 0x246   :  { %350 = vmin.xlane.f32.xlu0 %v349_v26 }
 0x2cf   :  { %v351_v28 = vpop.xlane.xlu0 %350 }
 0x2d0   :  { %vm352_vm6 = vcmp.eq.f32.partialorder %v349_v26, %v351_v28  ;;  %v357_v31 = vcvt.f32.s32 %v351_v28 }
 0x2d1   :  { %v353_v30 = vsel %vm352_vm6, %v348_v29, inf  ;;  %v310_v29 = vsel %vm296_vm4, %v1066_v42, 0.0 }
 0x2d2   :  { %354 = vmin.xlane.f32.xlu1 %v353_v30  ;;  %v358_v33 = vshll.u32 %v357_v31, 16  ;;  %v311_v30 = vsel %vm224_vm0, %v310_v29, 0.0 }
 0x35b   :  { %v355_v32 = vpop.xlane.xlu1 %354 }
 0x35c   :  { %v356_v34 = vcvt.f32.s32 %v355_v32 }
 0x35e   :  { %v1050_v35 = vadd.s32 %v358_v33, %v356_v34 }
 0x360   :  { %vm360_vm7 = vcmp.eq.s32.totalorder %v1030_v5, %v1050_v35 }
 0x361   :  { %v382_v36 = vsel %vm360_vm7, -1e+30, %v318_v20  ;;  %v374_v31 = vsel %vm360_vm7, %v1066_v42, 0.0 }
 0x362   :  { %v405_v37 = vsel %vm224_vm0, %v382_v36, -inf  ;;  %v375_v32 = vsel %vm224_vm0, %v374_v31, 0.0 }
 0x363   :  { %406 = vmax.xlane.f32.xlu0 %v405_v37 }
 0x3ec   :  { %v1058_v38 = vpop.xlane.xlu0 %406 }
 0x3ed   :  { %vm408_vm8 = vcmp.eq.f32.partialorder %v382_v36, %v1058_v38 }
 0x3ee   :  { %v409_v39 = vsel %vm408_vm8, %v1030_v5, 16 }
 0x3ef   :  { %v410_v40 = vsel %vm224_vm0, %v409_v39, 2147483647 }
 0x3f0   :  { %v412_v41 = vshra.s32 %v410_v40, 16  ;;  %v411_v47 = vand.u32 65535, %v410_v40 }
 0x3f2   :  { %v414_v43 = vcvt.s32.f32 %v412_v41  ;;  %v413_v49 = vcvt.s32.f32 %v411_v47 }
 0x3f4   :  { %415 = vmin.xlane.f32.xlu1 %v414_v43 }
 0x3f8   :  { %554 = vmax.xlane.f32.xlu1 %v553_v45 }
 0x47d   :  { %v416_v48 = vpop.xlane.xlu1 %415 }
 0x47e   :  { %vm417_vm9 = vcmp.eq.f32.partialorder %v414_v43, %v416_v48  ;;  %v422_v55 = vcvt.f32.s32 %v416_v48 }
 0x47f   :  { %v418_v50 = vsel %vm417_vm9, %v413_v49, inf }
 0x480   :  { %419 = vmin.xlane.f32.xlu0 %v418_v50  ;;  %v423_v57 = vshll.u32 %v422_v55, 16 }
 0x481   :  { %v1071_v51 = vpop.xlane.xlu1 %554 }
 0x482   :  { %vm569_vm10 = vcmp.eq.f32.partialorder %v552_v44, %v1071_v51 }
 0x483   :  { %v570_v52 = vsel %vm569_vm10, -1e+30, %v552_v44 }
 0x484   :  { %v575_v53 = vsel %vm224_vm0, %v570_v52, -inf }
 0x485   :  { %576 = vmax.xlane.f32.xlu1 %v575_v53 }
 0x496   :  { %230 = vperm.xlu1 %785, %v228_v54  }
 0x509   :  { %v420_v56 = vpop.xlane.xlu0 %419 }
 0x50a   :  { %v421_v58 = vcvt.f32.s32 %v420_v56 }
 0x50c   :  { %v424_v59 = vadd.s32 %v423_v57, %v421_v58 }
 0x50e   :  { %v1078_v60 = vpop.xlane.xlu1 %576  ;;  %vm425_vm11 = vcmp.eq.s32.totalorder %v1030_v5, %v424_v59 }
 0x50f   :  { %vm591_vm12 = vcmp.eq.f32.partialorder %v570_v52, %v1078_v60  ;;  %v447_v61 = vsel %vm425_vm11, -1e+30, %v382_v36  ;;  %v439_v33 = vsel %vm425_vm11, %v1066_v42, 0.0 }
 0x510   :  { %v470_v62 = vsel %vm224_vm0, %v447_v61, -inf  ;;  %v592_v63 = vsel %vm591_vm12, -1e+30, %v570_v52  ;;  %v440_v34 = vsel %vm224_vm0, %v439_v33, 0.0 }
 0x511   :  { %471 = vmax.xlane.f32.xlu0 %v470_v62  ;;  %v598_v1 = vsel %vm224_vm0, %v592_v63, -inf }
 0x512   :  { %599 = vmax.xlane.f32.xlu1 %v598_v1  ;;  %v231_v3 = vpop.permute.xlu1 %230 }
 0x513   :  { %vm232_vm13 = vcmp.eq.s32.totalorder %v1030_v5, %v231_v3 }
 0x514   :  { %v233_v4 = vsel %vm232_vm13, %v1066_v42, 0.0 }
 0x515   :  { %v234_v7 = vsel %vm224_vm0, %v233_v4, 0.0 }
 0x523   :  { %239 = vperm.xlu1 %785, %v237_v2  }
 0x547   :  { %235 = vadd.xlane.f32.xlu1 %v234_v7 }
 0x59a   :  { %v1092_v8 = vpop.xlane.xlu0 %471 }
 0x59b   :  { %vm473_vm14 = vcmp.eq.f32.partialorder %v447_v61, %v1092_v8  ;;  %v1100_v14 = vpop.xlane.xlu1 %599 }
 0x59c   :  { %v474_v9 = vsel %vm473_vm14, %v1030_v5, 16  ;;  %vm614_vm3 = vcmp.eq.f32.partialorder %v592_v63, %v1100_v14 }
 0x59d   :  { %v475_v10 = vsel %vm224_vm0, %v474_v9, 2147483647  ;;  %v615_v27 = vsel %vm614_vm3, -1e+30, %v592_v63 }
 0x59e   :  { %v477_v11 = vshra.s32 %v475_v10, 16  ;;  %v476_v18 = vand.u32 65535, %v475_v10  ;;  %v621_v28 = vsel %vm224_vm0, %v615_v27, -inf }
 0x59f   :  { %v1102_v15 = vpop.permute.xlu1 %239 }
 0x5a0   :  { %v479_v12 = vcvt.s32.f32 %v477_v11  ;;  %vm241_vm15 = vcmp.eq.s32.totalorder %v1030_v5, %v1102_v15  ;;  %v478_v21 = vcvt.s32.f32 %v476_v18 }
 0x5a1   :  { %v246_v16 = vsel %vm241_vm15, %v1066_v42, 0.0  ;;  %v242_v1 = vsel %vm241_vm15, %v1022_v0, 0.0 }
 0x5a2   :  { %480 = vmin.xlane.f32.xlu0 %v479_v12  ;;  %v247_v17 = vsel %vm224_vm0, %v246_v16, 0.0  ;;  %v243_v11 = vsel %vm224_vm0, %v242_v1, 0.0 }
 0x5a3   :  { %248 = vadd.xlane.f32.xlu1 %v247_v17 }
 0x5b8   :  { %220 = vperm.xlu0 %786, %v218_v13  }
 0x5d0   :  { %v236_v35 = vpop.xlane.xlu1 %235 }
 0x5d1   :  { %v556_v36 = vsub.f32 %v1071_v51, %v236_v35  ;;  %v578_v40 = vsub.f32 %v1078_v60, %v236_v35  ;;  %v601_v44 = vsub.f32 %v1100_v14, %v236_v35 }
 0x5d3   :  { %v1137_v37 = vadd.f32 0.3, %v556_v36  ;;  %v1143_v41 = vadd.f32 0.3, %v578_v40  ;;  %v1148_v47 = vadd.f32 0.3, %v601_v44 }
 0x5d5   :  { %v558_v39 = vmax.f32 %v1137_v37, 0.0  ;;  %v580_v45 = vmax.f32 %v1143_v41, 0.0  ;;  %v603_v53 = vmax.f32 %v1148_v47, 0.0 }
 0x5d7   :  { %vm559_vm4 = vcmp.eq.f32.partialorder %v558_v39, 0.0  ;;  %vm581_vm5 = vcmp.eq.f32.partialorder %v580_v45, 0.0  ;;  %vm1156_vm6 = vcmp.eq.f32.partialorder %v603_v53, 0.0 }
 0x5d8   :  { %v560_v43 = vsel %vm559_vm4, -100.0, %v1071_v51  ;;  %v582_v52 = vsel %vm581_vm5, -100.0, %v1078_v60  ;;  %v605_v63 = vsel %vm1156_vm6, -100.0, %v1100_v14 }
 0x5d9   :  { %v561_v46 = vmul.f32 10.0, %v560_v43  ;;  %v583_v57 = vmul.f32 10.0, %v582_v52  ;;  %v1174_v10 = vmul.f32 10.0, %v605_v63 }
 0x5db   :  { %v562_v49 = vmax.f32 %v561_v46, -1e+30 }
 0x5dd   :  { %v563_v51 = vsub.f32 -1e+30, %v562_v49  ;;  %v584_v62 = vmax.f32 %v562_v49, %v583_v57  ;;  %v566_v2 = vsub.f32 %v561_v46, %v562_v49 }
 0x5df   :  { %v564_v61 = vmul.f32 1.442695, %v563_v51  ;;  %v567_v14 = vmul.f32 1.442695, %v566_v2 }
 0x5e1   :  { %787 = vpow2.f32 %v564_v61 }
 0x5e2   :  { %789 = vpow2.f32 %v567_v14 }
 0x5ee   :  { %v788_v51 = vpop.eup %787 }
 0x5ef   :  { %v571_v2 = vmul.f32 0.0, %v788_v51 }
 0x62b   :  { %v481_v20 = vpop.xlane.xlu0 %480 }
 0x62c   :  { %vm482_vm1 = vcmp.eq.f32.partialorder %v479_v12, %v481_v20  ;;  %v487_v48 = vcvt.f32.s32 %v481_v20  ;;  %v585_v12 = vsub.f32 %v562_v49, %v584_v62 }
 0x62d   :  { %v483_v23 = vsel %vm482_vm1, %v478_v21, inf }
 0x62e   :  { %484 = vmin.xlane.f32.xlu0 %v483_v23  ;;  %v488_v54 = vshll.u32 %v487_v48, 16  ;;  %v588_v23 = vsub.f32 %v583_v57, %v584_v62 }
 0x630   :  { %v589_v33 = vmul.f32 1.442695, %v588_v23 }
 0x633   :  { %v221_v24 = vpop.permute.xlu0 %220 }
 0x634   :  { %vm222_vm2 = vcmp.eq.s32.totalorder %v1030_v5, %v221_v24  ;;  %v607_v24 = vmax.f32 %v584_v62, %v1174_v10 }
 0x635   :  { %v223_v25 = vsel %vm222_vm2, %v1022_v0, 0.0 }
 0x636   :  { %v225_v26 = vsel %vm224_vm0, %v223_v25, 0.0  ;;  %v608_v43 = vsub.f32 %v584_v62, %v607_v24  ;;  %v611_v52 = vsub.f32 %v1174_v10, %v607_v24 }
 0x637   :  { %226 = vadd.xlane.f32.xlu0 %v225_v26  ;;  %v586_v26 = vmul.f32 1.442695, %v585_v12  ;;  %v790_v12 = vpop.eup %789 }
 0x638   :  { %v609_v61 = vmul.f32 1.442695, %v608_v43  ;;  %v612_v10 = vmul.f32 1.442695, %v611_v52 }
 0x639   :  { %791 = vpow2.f32 %v586_v26 }
 0x63a   :  { %793 = vpow2.f32 %v589_v33 }
 0x63b   :  { %622 = vmax.xlane.f32.xlu0 %v621_v28 }
 0x63f   :  { %312 = vadd.xlane.f32.xlu0 %v311_v30 }
 0x643   :  { %376 = vadd.xlane.f32.xlu0 %v375_v32 }
 0x646   :  { %v792_v30 = vpop.eup %791 }
 0x647   :  { %441 = vadd.xlane.f32.xlu0 %v440_v34 }
 0x6b7   :  { %v485_v50 = vpop.xlane.xlu0 %484 }
 0x6b8   :  { %v486_v55 = vcvt.f32.s32 %v485_v50 }
 0x6ba   :  { %v489_v56 = vadd.s32 %v488_v54, %v486_v55 }
 0x6bc   :  { %vm490_vm7 = vcmp.eq.s32.totalorder %v1030_v5, %v489_v56 }
 0x6bd   :  { %v504_v59 = vsel %vm490_vm7, %v1066_v42, 0.0 }
 0x6be   :  { %v505_v60 = vsel %vm224_vm0, %v504_v59, 0.0 }
 0x6bf   :  { %506 = vadd.xlane.f32.xlu0 %v505_v60 }
 0x6c0   :  { %v227_v3 = vpop.xlane.xlu0 %226 }
 0x6c1   :  { %v297_v4 = vsub.f32 %v1032_v6, %v227_v3  ;;  %v361_v42 = vsub.f32 %v1045_v22, %v227_v3  ;;  %v426_v7 = vsub.f32 %v1058_v38, %v227_v3  ;;  %v491_v9 = vsub.f32 %v1092_v8, %v227_v3 }
 0x6c3   :  { %v1177_v13 = vadd.f32 0.3, %v297_v4  ;;  %v1179_v5 = vadd.f32 0.3, %v361_v42  ;;  %v1181_v0 = vadd.f32 0.3, %v426_v7  ;;  %244 = vadd.xlane.f32.xlu0 %v243_v11 }
 0x6c4   :  { %v1183_v15 = vadd.f32 0.3, %v491_v9  ;;  %v623_v16 = vpop.xlane.xlu0 %622 }
 0x6c5   :  { %v299_v17 = vmax.f32 %v1177_v13, 0.0  ;;  %v363_v18 = vmax.f32 %v1179_v5, 0.0  ;;  %v428_v20 = vmax.f32 %v1181_v0, 0.0  ;;  %v624_v21 = vsub.f32 %v623_v16, %v236_v35 }
 0x6c6   :  { %v493_v25 = vmax.f32 %v1183_v15, 0.0 }
 0x6c7   :  { %vm300_vm0 = vcmp.eq.f32.partialorder %v299_v17, 0.0  ;;  %vm364_vm8 = vcmp.eq.f32.partialorder %v363_v18, 0.0  ;;  %v1194_v27 = vadd.f32 0.3, %v624_v21  ;;  %vm1200_vm9 = vcmp.eq.f32.partialorder %v428_v20, 0.0 }
 0x6c8   :  { %v301_v28 = vsel %vm300_vm0, -100.0, %v1032_v6  ;;  %v365_v29 = vsel %vm364_vm8, -100.0, %v1045_v22  ;;  %vm1206_vm10 = vcmp.eq.f32.partialorder %v493_v25, 0.0  ;;  %v430_v40 = vsel %vm1200_vm9, -100.0, %v1058_v38 }
 0x6c9   :  { %v302_v31 = vmul.f32 10.0, %v301_v28  ;;  %v626_v34 = vmax.f32 %v1194_v27, 0.0  ;;  %v366_v36 = vmul.f32 10.0, %v365_v29  ;;  %v495_v44 = vsel %vm1206_vm10, -100.0, %v1092_v8  ;;  %v644_v27 = vld [vmem:[#allocation4] sm:$0x1] }
 0x6ca   :  { %v431_v54 = vmul.f32 10.0, %v430_v40  ;;  %v496_v62 = vmul.f32 10.0, %v495_v44  ;;  %v572_v21 = vadd.f32 %v790_v12, %v571_v2 }
 0x6cb   :  { %v303_v35 = vmax.f32 %v302_v31, -1e+30  ;;  %vm627_vm11 = vcmp.eq.f32.partialorder %v626_v34, 0.0 }
 0x6cc   :  { %v628_v50 = vsel %vm627_vm11, -100.0, %v623_v16  ;;  %v593_v32 = vmul.f32 %v792_v30, %v572_v21 }
 0x6cd   :  { %v304_v46 = vsub.f32 -1e+30, %v303_v35  ;;  %v307_v48 = vsub.f32 %v302_v31, %v303_v35  ;;  %v367_v49 = vmax.f32 %v303_v35, %v366_v36  ;;  %v629_v55 = vmul.f32 10.0, %v628_v50 }
 0x6cf   :  { %v305_v56 = vmul.f32 1.442695, %v304_v46  ;;  %v308_v57 = vmul.f32 1.442695, %v307_v48  ;;  %v368_v58 = vsub.f32 %v303_v35, %v367_v49  ;;  %v371_v59 = vsub.f32 %v366_v36, %v367_v49 }
 0x6d0   :  { %v432_v60 = vmax.f32 %v367_v49, %v431_v54  ;;  %v630_v63 = vmax.f32 %v607_v24, %v629_v55  ;;  %v573_v36 = vmul.f32 %v790_v12, %v558_v39 }
 0x6d1   :  { %795 = vpow2.f32 %v305_v56  ;;  %v369_v1 = vmul.f32 1.442695, %v368_v58  ;;  %v372_v42 = vmul.f32 1.442695, %v371_v59 }
 0x6d2   :  { %797 = vpow2.f32 %v308_v57  ;;  %v433_v3 = vsub.f32 %v367_v49, %v432_v60  ;;  %v497_v4 = vmax.f32 %v432_v60, %v496_v62  ;;  %v436_v7 = vsub.f32 %v431_v54, %v432_v60 }
 0x6d3   :  { %v631_v9 = vsub.f32 %v607_v24, %v630_v63  ;;  %799 = vpow2.f32 %v609_v61  ;;  %v634_v11 = vsub.f32 %v629_v55, %v630_v63  ;;  %v794_v24 = vpop.eup %793  ;;  %v574_v52 = vadd.f32 %v573_v36, %v571_v2 }
 0x6d4   :  { %801 = vpow2.f32 %v369_v1  ;;  %v434_v14 = vmul.f32 1.442695, %v433_v3  ;;  %v498_v16 = vsub.f32 %v432_v60, %v497_v4  ;;  %v437_v26 = vmul.f32 1.442695, %v436_v7 }
 0x6d5   :  { %v632_v23 = vmul.f32 1.442695, %v631_v9  ;;  %803 = vpow2.f32 %v372_v42  ;;  %v501_v28 = vsub.f32 %v496_v62, %v497_v4  ;;  %v635_v29 = vmul.f32 1.442695, %v634_v11 }
 0x6d6   :  { %805 = vpow2.f32 %v612_v10  ;;  %v499_v31 = vmul.f32 1.442695, %v498_v16  ;;  %v594_v40 = vadd.f32 %v794_v24, %v593_v32  ;;  %v595_v37 = vmul.f32 %v792_v30, %v574_v52 }
 0x6d7   :  { %807 = vpow2.f32 %v434_v14  ;;  %v502_v33 = vmul.f32 1.442695, %v501_v28  ;;  %v596_v13 = vmul.f32 %v794_v24, %v580_v45 }
 0x6d8   :  { %809 = vpow2.f32 %v632_v23 }
 0x6d9   :  { %811 = vpow2.f32 %v437_v26  ;;  %v597_v42 = vadd.f32 %v596_v13, %v595_v37 }
 0x6da   :  { %813 = vpow2.f32 %v635_v29 }
 0x6db   :  { %815 = vpow2.f32 %v499_v31 }
 0x6dc   :  { %817 = vpow2.f32 %v502_v33 }
 0x6de   :  { %v796_v35 = vpop.eup %795 }
 0x6df   :  { %v798_v43 = vpop.eup %797  ;;  %v319_v44 = vmul.f32 0.0, %v796_v35 }
 0x6e0   :  { %v321_v46 = vmul.f32 %v798_v43, %v299_v17  ;;  %v800_v48 = vpop.eup %799 }
 0x6e1   :  { %v320_v49 = vadd.f32 %v798_v43, %v319_v44  ;;  %v802_v50 = vpop.eup %801  ;;  %v616_v54 = vmul.f32 %v800_v48, %v594_v40  ;;  %v618_v14 = vmul.f32 %v800_v48, %v597_v42 }
 0x6e2   :  { %v322_v55 = vadd.f32 %v321_v46, %v319_v44  ;;  %v804_v56 = vpop.eup %803 }
 0x6e3   :  { %v383_v51 = vmul.f32 %v802_v50, %v320_v49  ;;  %v806_v57 = vpop.eup %805  ;;  %v386_v2 = vmul.f32 %v804_v56, %v363_v18 }
 0x6e4   :  { %v808_v59 = vpop.eup %807  ;;  %v617_v39 = vadd.f32 %v806_v57, %v616_v54  ;;  %v385_v60 = vmul.f32 %v802_v50, %v322_v55  ;;  %v619_v41 = vmul.f32 %v806_v57, %v603_v53 }
 0x6e5   :  { %v384_v58 = vadd.f32 %v804_v56, %v383_v51  ;;  %v810_v61 = vpop.eup %809 }
 0x6e6   :  { %v812_v63 = vpop.eup %811  ;;  %v637_v17 = vmul.f32 %v810_v61, %v617_v39  ;;  %v387_v9 = vadd.f32 %v386_v2, %v385_v60  ;;  %v620_v5 = vadd.f32 %v619_v41, %v618_v14 }
 0x6e7   :  { %v448_v62 = vmul.f32 %v808_v59, %v384_v58  ;;  %v814_v1 = vpop.eup %813  ;;  %v451_v45 = vmul.f32 %v812_v63, %v428_v20 }
 0x6e8   :  { %v816_v4 = vpop.eup %815  ;;  %v638_v7 = vadd.f32 %v814_v1, %v637_v17  ;;  %v450_v16 = vmul.f32 %v808_v59, %v387_v9  ;;  %v639_v21 = vmul.f32 %v810_v61, %v620_v5  ;;  %v640_v23 = vmul.f32 %v814_v1, %v626_v34 }
 0x6e9   :  { %v449_v3 = vadd.f32 %v812_v63, %v448_v62  ;;  %v818_v11 = vpop.eup %817 }
 0x6ea   :  { %819 = vrcp.f32 %v638_v7  ;;  %v452_v18 = vadd.f32 %v451_v45, %v450_v16  ;;  %v641_v28 = vadd.f32 %v640_v23, %v639_v21  ;;  %v515_v30 = vmul.f32 %v818_v11, %v493_v25  ;;  %v537_v25 = vld [vmem:[#allocation2] sm:$0x1] }
 0x6eb   :  { %v512_v10 = vmul.f32 %v816_v4, %v449_v3 }
 0x6ec   :  { %v514_v26 = vmul.f32 %v816_v4, %v452_v18 }
 0x6ed   :  { %v513_v12 = vadd.f32 %v818_v11, %v512_v10 }
 0x6ee   :  { %v516_v32 = vadd.f32 %v515_v30, %v514_v26 }
 0x6ef   :  { %821 = vrcp.f32 %v513_v12 }
 0x6f7   :  { %v820_v29 = vpop.eup %819 }
 0x6f8   :  { %v643_v31 = vmul.f32 %v820_v29, %v641_v28 }
 0x6fa   :  { %v646_v47 = vrot.slane %v643_v31, 4 }
 0x6fc   :  { %v822_v24 = vpop.eup %821  ;;  %v647_v33 = vadd.f32 %v646_v47, %v643_v31 }
 0x6fd   :  { %v535_v53 = vmul.f32 %v822_v24, %v516_v32 }
 0x6fe   :  { %v648_v20 = vrot.slane %v647_v33, 2 }
 0x6ff   :  { %v538_v0 = vrot.slane %v535_v53, 4 }
 0x700   :  { %v649_v36 = vadd.f32 %v648_v20, %v647_v33 }
 0x701   :  { %v539_v35 = vadd.f32 %v538_v0, %v535_v53 }
 0x702   :  { %v650_v43 = vrot.slane %v649_v36, 1 }
 0x703   :  { %v540_v40 = vrot.slane %v539_v35, 2 }
 0x704   :  { %v651_v44 = vadd.f32 %v650_v43, %v649_v36 }
 0x705   :  { %v541_v34 = vadd.f32 %v540_v40, %v539_v35 }
 0x706   :  { %v652_v15 = vadd.f32 %v651_v44, %v644_v27 }
 0x707   :  { %v542_v46 = vrot.slane %v541_v34, 1 }
 0x708   :  { %653 = vst [vmem:[#allocation4] sm:$0x1] %v652_v15 }
 0x709   :  { %v543_v48 = vadd.f32 %v542_v46, %v541_v34 }
 0x70a   :  { %834 = shalt.err (!%p831_p4)
}
 0x70b   :  { %673 = dma.vmem_to_hbm [thread:$0]  %s671_s24, 16, %s1286_s7, [#allocation5]   ;;  %v544_v49 = vadd.f32 %v543_v48, %v537_v25 }
 0x70c   :  { %s843_s12 = scalar_lea.vmem %s661_s26, 16  ;;  %s847_s13 = scalar_lea.vmem %s661_s26, 32 }
 0x70d   :  { %545 = vst [vmem:[#allocation2] sm:$0x1] %v544_v49  ;;  %p844_p5 = scmp.ne.s32.totalorder %s661_s26, %s843_s12  ;;  %p848_p6 = scmp.lt.s32.totalorder %s661_s26, %s661_s26 }
 0x70e   :  { %p849_p7 = scmp.lt.s32.totalorder %s847_s13, %s843_s12 }
 0x710   :  { %p850_p8 = por %p849_p7, %p848_p6 }
 0x712   :  { %p851_p9 = pnand %p850_p8, %p844_p5 }
 0x714   :  { %854 = shalt.err (!%p851_p9)
}
 0x715   :  { %663 = dma.vmem_to_hbm [thread:$0]  %s661_s26, 16, %s1285_s6, [#allocation3]   ;;  %v313_v50 = vpop.xlane.xlu0 %312  ;;  %v249_v29 = vpop.xlane.xlu1 %248 }
 0x716   :  { %v314_v51 = vsub.f32 %v1032_v6, %v313_v50  ;;  %s955_s6 = smov [#allocation6]   ;;  %s956_s16 = smov [#allocation10]  }
 0x717   :  { %s680_s7 = sshll.u32 %s955_s6, 4  ;;  %s710_s17 = sshll.u32 %s956_s16, 4  ;;  %s681_s7 = int_to_ptr.vmem [resolvable:$true] %s680_s7  ;;  %s711_s17 = int_to_ptr.vmem [resolvable:$true] %s710_s17 }
 0x718   :  { %v315_v58 = vadd.f32 0.1, %v314_v51  ;;  %s957_s18 = smov [#allocation7]   ;;  %s958_s20 = smov [#allocation9]  }
 0x719   :  { %v377_v52 = vpop.xlane.xlu0 %376  ;;  %s690_s19 = sshll.u32 %s957_s18, 4  ;;  %s700_s0 = sshll.u32 %s958_s20, 4  ;;  %s1251_s19 = int_to_ptr.vmem [resolvable:$true] %s690_s19  ;;  %s1253_s0 = int_to_ptr.vmem [resolvable:$true] %s700_s0 }
 0x71a   :  { %v378_v55 = vsub.f32 %v1045_v22, %v377_v52  ;;  %v316_v39 = vmax.f32 %v315_v58, 0.0  ;;  %s863_s2 = scalar_lea.vmem %s681_s7, 16  ;;  %s867_s1 = scalar_lea.vmem %s681_s7, 32 }
 0x71b   :  { %p864_p10 = scmp.ne.s32.totalorder %s681_s7, %s863_s2  ;;  %p868_p11 = scmp.lt.s32.totalorder %s681_s7, %s681_s7 }
 0x71c   :  { %v379_v57 = vadd.f32 0.1, %v378_v55  ;;  %vm330_vm13 = vcmp.gt.f32.partialorder %v316_v39, 0.0  ;;  %v323_v13 = vrot.slane %v316_v39, 4  ;;  %p869_p12 = scmp.lt.s32.totalorder %s867_s1, %s863_s2 }
 0x71d   :  { %v442_v54 = vpop.xlane.xlu0 %441  ;;  %v773_v63 = vsel %vm330_vm13, 1.0, %v952_v19 }
 0x71e   :  { %v443_v56 = vsub.f32 %v1058_v38, %v442_v54  ;;  %v380_v37 = vmax.f32 %v379_v57, 0.0  ;;  %v333_v38 = vrot.slane %v773_v63, 4  ;;  %v324_v3 = vadd.f32 %v323_v13, %v316_v39  ;;  %p870_p13 = por %p869_p12, %p868_p11 }
 0x720   :  { %v444_v59 = vadd.f32 0.1, %v443_v56  ;;  %vm395_vm12 = vcmp.gt.f32.partialorder %v380_v37, 0.0  ;;  %v388_v62 = vrot.slane %v380_v37, 4  ;;  %v334_v7 = vadd.f32 %v773_v63, %v333_v38  ;;  %p871_p0 = pnand %p870_p13, %p864_p10 }
 0x721   :  { %v774_v60 = vsel %vm395_vm12, 1.0, %v952_v19  ;;  %v325_v11 = vrot.slane %v324_v3, 2 }
 0x722   :  { %v445_v61 = vmax.f32 %v444_v59, 0.0  ;;  %v398_v6 = vrot.slane %v774_v60, 4  ;;  %v389_v1 = vadd.f32 %v388_v62, %v380_v37  ;;  %v335_v45 = vrot.slane %v334_v7, 2 }
 0x723   :  { %v326_v23 = vadd.f32 %v325_v11, %v324_v3 }
 0x724   :  { %vm460_vm14 = vcmp.gt.f32.partialorder %v445_v61, 0.0  ;;  %v453_v17 = vrot.slane %v445_v61, 4  ;;  %v399_v4 = vadd.f32 %v774_v60, %v398_v6  ;;  %v390_v9 = vrot.slane %v389_v1, 2 }
 0x725   :  { %v775_v22 = vsel %vm460_vm14, 1.0, %v952_v19  ;;  %v336_v24 = vadd.f32 %v335_v45, %v334_v7  ;;  %v327_v20 = vrot.slane %v326_v23, 1  ;;  %v254_v7 = vld [vmem:[#allocation6] sm:$0x1] }
 0x726   :  { %v463_v2 = vrot.slane %v775_v22, 4  ;;  %v454_v42 = vadd.f32 %v453_v17, %v445_v61  ;;  %v400_v12 = vrot.slane %v399_v4, 2  ;;  %v391_v5 = vadd.f32 %v390_v9, %v389_v1  ;;  %v546_v1 = vld [vmem:[#allocation9] sm:$0x1]  ;;  %v549_v9 = vld [vmem:[#allocation10] sm:$0x1] }
 0x727   :  { %v337_v34 = vrot.slane %v336_v24, 1  ;;  %v328_v49 = vadd.f32 %v327_v20, %v326_v23 }
 0x728   :  { %v464_v10 = vadd.f32 %v775_v22, %v463_v2  ;;  %v455_v14 = vrot.slane %v454_v42, 2  ;;  %v401_v26 = vadd.f32 %v400_v12, %v399_v4  ;;  %v392_v47 = vrot.slane %v391_v5, 1 }
 0x729   :  { %v338_v58 = vadd.f32 %v337_v34, %v336_v24 }
 0x72a   :  { %v465_v18 = vrot.slane %v464_v10, 2  ;;  %v456_v28 = vadd.f32 %v455_v14, %v454_v42  ;;  %v402_v35 = vrot.slane %v401_v26, 1  ;;  %v393_v44 = vadd.f32 %v392_v47, %v391_v5 }
 0x72c   :  { %v466_v53 = vadd.f32 %v465_v18, %v464_v10  ;;  %v403_v50 = vadd.f32 %v402_v35, %v401_v26  ;;  %v394_v59 = vadd.f32 %v393_v44, %v328_v49 }
 0x72e   :  { %v467_v46 = vrot.slane %v466_v53, 1  ;;  %v404_v22 = vadd.f32 %v403_v50, %v338_v58 }
 0x730   :  { %v468_v37 = vadd.f32 %v467_v46, %v466_v53 }
 0x732   :  { %v469_v2 = vadd.f32 %v468_v37, %v404_v22 }
 0x748   :  { %v507_v16 = vpop.xlane.xlu0 %506 }
 0x749   :  { %v508_v41 = vsub.f32 %v1092_v8, %v507_v16  ;;  %v457_v8 = vrot.slane %v456_v28, 1  ;;  %v263_v16 = vld [vmem:[#allocation7] sm:$0x1] }
 0x74b   :  { %v509_v21 = vadd.f32 0.1, %v508_v41  ;;  %v458_v52 = vadd.f32 %v457_v8, %v456_v28 }
 0x74c   :  { %v245_v30 = vpop.xlane.xlu0 %244 }
 0x74d   :  { %v510_v31 = vmax.f32 %v509_v21, 0.0  ;;  %v250_v32 = vsub.f32 %v249_v29, %v245_v30  ;;  %v459_v63 = vadd.f32 %v458_v52, %v394_v59 }
 0x74f   :  { %v517_v33 = vrot.slane %v510_v31, 4  ;;  %vm524_vm15 = vcmp.gt.f32.partialorder %v510_v31, 0.0  ;;  %v251_v0 = vadd.f32 0.1, %v250_v32 }
 0x750   :  { %v776_v36 = vsel %vm524_vm15, 1.0, %v952_v19 }
 0x751   :  { %v518_v40 = vadd.f32 %v517_v33, %v510_v31  ;;  %v527_v43 = vrot.slane %v776_v36, 4  ;;  %v252_v27 = vmax.f32 %v251_v0, 0.0 }
 0x753   :  { %v519_v15 = vrot.slane %v518_v40, 2  ;;  %v528_v25 = vadd.f32 %v776_v36, %v527_v43  ;;  %v255_v48 = vrot.slane %v252_v27, 4  ;;  %vm264_vm1 = vcmp.gt.f32.partialorder %v252_v27, 0.0 }
 0x754   :  { %v772_v54 = vsel %vm264_vm1, 1.0, %v952_v19 }
 0x755   :  { %v520_v55 = vadd.f32 %v519_v15, %v518_v40  ;;  %v529_v51 = vrot.slane %v528_v25, 2  ;;  %v256_v56 = vadd.f32 %v255_v48, %v252_v27  ;;  %v267_v57 = vrot.slane %v772_v54, 4 }
 0x757   :  { %v521_v39 = vrot.slane %v520_v55, 1  ;;  %v530_v61 = vadd.f32 %v529_v51, %v528_v25  ;;  %v257_v60 = vrot.slane %v256_v56, 2  ;;  %v268_v62 = vadd.f32 %v772_v54, %v267_v57 }
 0x759   :  { %v258_v13 = vadd.f32 %v257_v60, %v256_v56  ;;  %v269_v6 = vrot.slane %v268_v62, 2  ;;  %v522_v17 = vadd.f32 %v521_v39, %v520_v55  ;;  %v531_v38 = vrot.slane %v530_v61, 1 }
 0x75b   :  { %v270_v19 = vadd.f32 %v269_v6, %v268_v62  ;;  %v259_v3 = vrot.slane %v258_v13, 1  ;;  %v523_v4 = vadd.f32 %v522_v17, %v459_v63  ;;  %v532_v42 = vadd.f32 %v531_v38, %v530_v61 }
 0x75d   :  { %v271_v10 = vrot.slane %v270_v19, 1  ;;  %v260_v11 = vadd.f32 %v259_v3, %v258_v13  ;;  %v547_v12 = vadd.f32 %v546_v1, %v523_v4  ;;  %v533_v14 = vadd.f32 %v532_v42, %v469_v2 }
 0x75f   :  { %v272_v41 = vadd.f32 %v271_v10, %v270_v19  ;;  %v261_v45 = vadd.f32 %v260_v11, %v254_v7  ;;  %548 = vst [vmem:[#allocation9] sm:$0x1] %v547_v12  ;;  %v550_v5 = vadd.f32 %v549_v9, %v533_v14 }
 0x761   :  { %v273_v18 = vadd.f32 %v272_v41, %v263_v16  ;;  %262 = vst [vmem:[#allocation6] sm:$0x1] %v261_v45  ;;  %551 = vst [vmem:[#allocation10] sm:$0x1] %v550_v5 }
 0x762   :  { %874 = shalt.err (!%p871_p0)
}
 0x763   :  { %683 = dma.vmem_to_hbm [thread:$0]  %s681_s7, 16, %s1287_s8, [#allocation5]   ;;  %274 = vst [vmem:[#allocation7] sm:$0x1] %v273_v18 }
 0x764   :  { %s883_s22 = scalar_lea.vmem %s711_s17, 16  ;;  %s887_s5 = scalar_lea.vmem %s711_s17, 32 }
 0x765   :  { %p884_p1 = scmp.ne.s32.totalorder %s711_s17, %s883_s22  ;;  %p888_p2 = scmp.lt.s32.totalorder %s711_s17, %s711_s17 }
 0x766   :  { %p889_p3 = scmp.lt.s32.totalorder %s887_s5, %s883_s22 }
 0x768   :  { %p890_p4 = por %p889_p3, %p888_p2 }
 0x76a   :  { %p891_p5 = pnand %p890_p4, %p884_p1 }
 0x76c   :  { %894 = shalt.err (!%p891_p5)
}
 0x76d   :  { %713 = dma.vmem_to_hbm [thread:$0]  %s711_s17, 16, %s1290_s11, [#allocation11]  }
 0x76e   :  { %s903_s24 = scalar_lea.vmem %s1251_s19, 16  ;;  %s907_s8 = scalar_lea.vmem %s1251_s19, 32 }
 0x76f   :  { %p904_p6 = scmp.ne.s32.totalorder %s1251_s19, %s903_s24  ;;  %p908_p7 = scmp.lt.s32.totalorder %s1251_s19, %s1251_s19 }
 0x770   :  { %p909_p8 = scmp.lt.s32.totalorder %s907_s8, %s903_s24 }
 0x772   :  { %p910_p9 = por %p909_p8, %p908_p7 }
 0x774   :  { %p911_p10 = pnand %p910_p9, %p904_p6 }
 0x776   :  { %914 = shalt.err (!%p911_p10)
}
 0x777   :  { %693 = dma.vmem_to_hbm [thread:$0]  %s1251_s19, 16, %s1288_s9, [#allocation8]  }
 0x778   :  { %s923_s27 = scalar_lea.vmem %s1253_s0, 16  ;;  %s927_s11 = scalar_lea.vmem %s1253_s0, 32 }
 0x779   :  { %p924_p11 = scmp.ne.s32.totalorder %s1253_s0, %s923_s27  ;;  %p928_p12 = scmp.lt.s32.totalorder %s1253_s0, %s1253_s0 }
 0x77a   :  { %p929_p13 = scmp.lt.s32.totalorder %s927_s11, %s923_s27 }
 0x77c   :  { %p930_p0 = por %p929_p13, %p928_p12 }
 0x77e   :  { %p931_p1 = pnand %p930_p0, %p924_p11 }
 0x780   :  { %934 = shalt.err (!%p931_p1)
}
 0x781   :  { %703 = dma.vmem_to_hbm [thread:$0]  %s1253_s0, 16, %s1289_s10, [#allocation8]  }
 0x782   :  { %943 = dma.done.wait [#allocation3], 16  }
 0x783   :  { %944 = vsyncadd [#allocation3], 4294967280 }
 0x784   :  { %945 = dma.done.wait [#allocation5], 32  }
 0x785   :  { %946 = vsyncadd [#allocation5], 4294967264 }
 0x786   :  { %947 = dma.done.wait [#allocation8], 32  }
 0x787   :  { %948 = vsyncadd [#allocation8], 4294967264 }
 0x788   :  { %949 = dma.done.wait [#allocation11], 16  }
 0x789   :  { %950 = vsyncadd [#allocation11], 4294967280 }
 0x78a   :  { %732 = vsyncpa [#allocation3], 1 }
 0x78b   :  { %733 = vsyncpa [#allocation5], 1 }
 0x78c   :  { %734 = vsyncpa [#allocation8], 1 }
 0x78d   :  { %735 = vsyncpa [#allocation11], 1 }

</bundles_post_ra>
